<compile_context>
chip_gen: v5e
topology: v5e:2x2
jax: 0.10.0
libtpu: 0.0.40
codegen_flags: <defaults>
</compile_context>

<pallas_src>
import numpy as np
import jax
import jax.numpy as jnp
from jax import lax
from jax.experimental import pallas as pl
from jax.experimental.pallas import tpu as pltpu

_SOBEL = ((-1.0, 0.0, 1.0), (-2.0, 0.0, 2.0), (-1.0, 0.0, 1.0))  # /8 in the module


def _build_keep_masks(N, C, H, W):
    """(4*C, N*H*W) f32 border masks, pre-broadcast over channels.

    Slab j (rows j*C:(j+1)*C) keeps a lane only if the value rolled in for tap
    j came from inside the same image row/column (zero-padding semantics):
      j=0: tap (h, w+1) -> keep where w != W-1
      j=1: tap (h, w-1) -> keep where w != 0
      j=2: tap (h+1, w) -> keep where h != H-1
      j=3: tap (h-1, w) -> keep where h != 0
    Lane index = n*H*W + h*W + w, so every cross-row / cross-image /
    cross-batch bleed of a +-1 / +-W lane roll is zeroed by these masks.
    """
    L = N * H * W
    p = np.arange(L)
    r = p % (H * W)
    w = r % W
    h = r // W
    m = np.stack([(w != W - 1), (w != 0), (h != H - 1), (h != 0)]).astype(np.float32)
    return jnp.asarray(np.repeat(m[:, None, :], C, axis=1).reshape(4 * C, L))


def _make_ca_kernel(C, H, W, L, n_steps):
    def kernel(x_ref, keep_ref, ones_ref, w1_ref, w2_ref, fire_ref, out_ref):
        # Hoisted once per call (no per-step reloads / re-broadcasts).
        kwp = keep_ref[0 * C:1 * C, :]   # keep tap from (h, w+1)
        kwm = keep_ref[1 * C:2 * C, :]   # keep tap from (h, w-1)
        khp = keep_ref[2 * C:3 * C, :]   # keep tap from (h+1, w)
        khm = keep_ref[3 * C:4 * C, :]   # keep tap from (h-1, w)
        kwp1, kwm1 = kwp[3:4, :], kwm[3:4, :]     # alpha-plane (1, L) variants
        khp1, khm1 = khp[3:4, :], khm[3:4, :]
        w1 = w1_ref[...]          # (hid, 3C+8): [id | sobel_x | sobel_y | bias | 0]
        w2 = w2_ref[...]          # (C, hid)
        ones_pad = ones_ref[...]  # (8, L): row 0 = 1 (bias row), rows 1..7 = 0

        def roll_l(v, s):         # lane roll; wrapped lanes zeroed by keep masks
            return jnp.roll(v, s, axis=1)

        def pool3(a):
            # 3x3 stride-1 max-pool of a (1, L) plane, zero fill at borders.
            # Zero fill == torch's -inf padded max_pool2d for the strictly
            # positive `> 0.1` living test (do not reuse if threshold <= 0).
            m = jnp.maximum(a, jnp.maximum(roll_l(a, -1) * kwp1, roll_l(a, 1) * kwm1))
            return jnp.maximum(m, jnp.maximum(roll_l(m, -W) * khp1, roll_l(m, W) * khm1))

        def step(t, x):                                    # x: (C, L), fused batch
            pre_live = pool3(x[3:4, :]) > 0.1              # (1, L)

            # perceive: separable Sobel cross-correlation, zero padded.
            xp = roll_l(x, -1) * kwp                       # value at (h, w+1)
            xm = roll_l(x, 1) * kwm                        # value at (h, w-1)
            d_w = xp - xm                                  # [-1, 0, 1] along w
            s_w = xp + x + x + xm                          # [ 1, 2, 1] along w
            y_sx = (roll_l(d_w, W) * khm + d_w + d_w + roll_l(d_w, -W) * khp) * 0.125
            y_sy = (roll_l(s_w, -W) * khp - roll_l(s_w, W) * khm) * 0.125

            # update: conv1 as ONE fused K=3C+8 MXU matmul (bias folded through
            # the ones row), then ReLU, then conv2 as a second matmul.
            stacked = jnp.concatenate([x, y_sx, y_sy, ones_pad], axis=0)  # (3C+8, L)
            h = jnp.maximum(
                jnp.dot(w1, stacked, preferred_element_type=jnp.float32), 0.0)
            dx = jnp.dot(w2, h, preferred_element_type=jnp.float32)       # (C, L)

            # stochastic update: per-pixel fire mask broadcasts over channels.
            x_new = x + dx * fire_ref[t]                   # fire_ref[t]: (1, L)

            post_live = pool3(x_new[3:4, :]) > 0.1
            life = jnp.logical_and(pre_live, post_live).astype(jnp.float32)
            return x_new * life

        out_ref[...] = lax.fori_loop(0, n_steps, step, x_ref[...])

    return kernel


def ca_forward(x_nchw, w1, b1, w2, *, fire_rate=0.5, n_steps=1, key=None, seed=0):
    """CAModel.forward iterated `n_steps` times inside one kernel.

    Args:
      x_nchw: (N, C, H, W) state, alpha channel at index 3.
      w1: (hidden, 3*C) first 1x1-conv weight, PyTorch-native interleaved
          input-channel order [id(c0), sx(c0), sy(c0), id(c1), ...].
      b1: (hidden,) first-conv bias.
      w2: (C, hidden) second 1x1-conv weight (bias-free).
    Returns (new state (N, C, H, W), fire masks (n_steps, N, 1, H, W)).
    """
    N, C, H, W = x_nchw.shape
    if C < 4:
        raise ValueError("CAModel needs n_channels >= 4 (alpha is channel 3)")
    hid = w1.shape[0]
    L = N * H * W

    # channels on the sublane axis, flattened (n, h, w) on the lane axis.
    x2 = jnp.transpose(jnp.asarray(x_nchw, jnp.float32), (1, 0, 2, 3)).reshape(C, L)

    # Regroup torch's interleaved perceive channels into [id | sx | sy] slabs,
    # fold the bias in as an extra K column, zero-pad K to 3C+8 (multiple of 8).
    perm = np.concatenate([np.arange(C) * 3 + j for j in range(3)])
    w1g = jnp.asarray(w1, jnp.float32)[:, perm]                        # (hid, 3C)
    w1aug = jnp.concatenate(
        [w1g, jnp.asarray(b1, jnp.float32).reshape(hid, 1),
         jnp.zeros((hid, 7), jnp.float32)], axis=1)                    # (hid, 3C+8)
    w2f = jnp.asarray(w2, jnp.float32)                                 # (C, hid)

    keep = _build_keep_masks(N, C, H, W)                               # (4C, L)
    ones_pad = jnp.zeros((8, L), jnp.float32).at[0, :].set(1.0)

    # Bernoulli(fire_rate) per pixel per step, drawn host-side with jax.random
    # (torch.rand(...) <= fire_rate semantics; keeps the kernel free of the
    # on-chip PRNG, which has no interpret/CPU lowering).
    if key is None:
        key = jax.random.PRNGKey(seed)
    fire = (jax.random.uniform(key, (n_steps, 1, L)) <= fire_rate).astype(jnp.float32)

    flops = 2 * n_steps * L * hid * ((3 * C + 8) + C)
    bytes_accessed = 4 * (2 * C * L + 4 * C * L + hid * (3 * C + 8) + C * hid
                          + n_steps * L + 8 * L)

    vmem = pl.BlockSpec(memory_space=pltpu.MemorySpace.VMEM)
    out2 = pl.pallas_call(
        _make_ca_kernel(C, H, W, L, n_steps),
        out_shape=jax.ShapeDtypeStruct((C, L), jnp.float32),
        in_specs=[vmem] * 6,
        out_specs=vmem,
        cost_estimate=pl.CostEstimate(flops=flops, transcendentals=0,
                                      bytes_accessed=bytes_accessed),
    )(x2, keep, ones_pad, w1aug, w2f, fire)

    out = jnp.transpose(out2.reshape(C, N, H, W), (1, 0, 2, 3))
    fire_out = jnp.transpose(fire.reshape(n_steps, 1, N, H, W), (0, 2, 1, 3, 4))
    return out, fire_out


def _reference_forward(x_nchw, w1, b1, w2, fire_masks):
    """Pure-JAX (XLA) reference in the PyTorch layout / channel ordering."""
    x = jnp.asarray(x_nchw, jnp.float32)
    N, C, H, W = x.shape
    sx = jnp.array(_SOBEL, jnp.float32) / 8.0
    sy = sx.T

    def maxpool3(a):                        # (N, 1, H, W), -inf padded like torch
        return lax.reduce_window(a, -jnp.inf, lax.max, (1, 1, 3, 3), (1, 1, 1, 1),
                                 padding=((0, 0), (0, 0), (1, 1), (1, 1)))

    def dwconv(xx, k):                      # depthwise 3x3, zero padded
        rhs = jnp.broadcast_to(k[None, None, :, :], (C, 1, 3, 3))
        return lax.conv_general_dilated(xx, rhs, (1, 1), ((1, 1), (1, 1)),
                                        dimension_numbers=('NCHW', 'OIHW', 'NCHW'),
                                        feature_group_count=C,
                                        precision=lax.Precision.HIGHEST)

    for t in range(fire_masks.shape[0]):
        pre = maxpool3(x[:, 3:4]) > 0.1
        # perceive with torch's interleaved output channels [id(c), sx(c), sy(c)]
        y = jnp.stack([x, dwconv(x, sx), dwconv(x, sy)], axis=2).reshape(N, 3 * C, H, W)
        h = jnp.maximum(
            jnp.einsum('nkhw,jk->njhw', y, w1, precision=lax.Precision.HIGHEST)
            + b1.reshape(1, -1, 1, 1), 0.0)
        dx = jnp.einsum('njhw,cj->nchw', h, w2, precision=lax.Precision.HIGHEST)
        x_new = x + dx * fire_masks[t]
        post = maxpool3(x_new[:, 3:4]) > 0.1
        x = x_new * jnp.logical_and(pre, post).astype(jnp.float32)
    return x


if __name__ == "__main__":
    N, C, H, W, HID = 2, 16, 16, 16, 128   # module defaults: n_channels=16, hidden=128
    FIRE_RATE = 0.5

    root = jax.random.PRNGKey(0)
    k1, k2, k3, k4, k5 = jax.random.split(root, 5)
    x = jax.random.uniform(k1, (N, C, H, W), jnp.float32)
    # PyTorch-native layouts: conv1 weight (hid, 3C) with interleaved perceive
    # inputs, bias (hid,), conv2 weight (C, hid).  (The module zero-inits
    # conv2; a non-zero init exercises the matmul path -- semantics identical.)
    w1 = jax.random.normal(k2, (HID, 3 * C), jnp.float32) * 0.1
    b1 = jax.random.normal(k3, (HID,), jnp.float32) * 0.1
    w2 = jax.random.normal(k4, (C, HID), jnp.float32) * 0.1

    # ---- single forward step (== CAModel.forward) ----
    out, fire = ca_forward(x, w1, b1, w2, fire_rate=FIRE_RATE, n_steps=1, key=k5)
    jax.block_until_ready(out)
    assert out.shape == (N, C, H, W)
    assert fire.shape == (1, N, 1, H, W)
    assert bool(jnp.all((fire == 0.0) | (fire == 1.0)))
    rate = float(jnp.mean(fire))
    assert 0.25 < rate < 0.75, f"suspicious fire rate {rate}"
    ref = _reference_forward(x, w1, b1, w2, fire)
    err = float(jnp.max(jnp.abs(out - ref)))
    # 2e-3 tolerance covers a worst-case single-pass-bf16 MXU f32 dot on HW;
    # exact-f32 paths (interpret / multi-pass MXU) land near 1e-6.
    assert err < 2e-3, f"1-step max abs err = {err}"

    # ---- multi-step rollout: steps loop in-kernel, state resident in VMEM ----
    out4, fire4 = ca_forward(x, w1, b1, w2, fire_rate=FIRE_RATE, n_steps=4, key=k5)
    jax.block_until_ready(out4)
    ref4 = _reference_forward(x, w1, b1, w2, fire4)
    err4 = float(jnp.max(jnp.abs(out4 - ref4)))
    assert err4 < 2e-3, f"4-step max abs err = {err4}"

    print("KERNEL_OK")
</pallas_src>

<mosaic_0001>
module attributes {stable_mosaic.version = 11 : i64} {
  func.func @kernel(%arg0: memref<16x512xf32, #tpu.memory_space<vmem>>, %arg1: memref<64x512xf32, #tpu.memory_space<vmem>>, %arg2: memref<8x512xf32, #tpu.memory_space<vmem>>, %arg3: memref<128x56xf32, #tpu.memory_space<vmem>>, %arg4: memref<16x128xf32, #tpu.memory_space<vmem>>, %arg5: memref<1x1x512xf32, #tpu.memory_space<vmem>>, %arg6: memref<16x512xf32, #tpu.memory_space<vmem>>) attributes {dimension_semantics = [], scalar_prefetch = 0 : i64, scratch_operands = 0 : i64, tpu.core_type = #tpu.core_type<tc>} {
    %c0 = arith.constant 0 : index
    %c0_0 = arith.constant 0 : index
    %0 = vector.load %arg1[%c0, %c0_0] : memref<64x512xf32, #tpu.memory_space<vmem>>, vector<16x512xf32>
    %c16 = arith.constant 16 : index
    %c0_1 = arith.constant 0 : index
    %1 = vector.load %arg1[%c16, %c0_1] : memref<64x512xf32, #tpu.memory_space<vmem>>, vector<16x512xf32>
    %c32 = arith.constant 32 : index
    %c0_2 = arith.constant 0 : index
    %2 = vector.load %arg1[%c32, %c0_2] : memref<64x512xf32, #tpu.memory_space<vmem>>, vector<16x512xf32>
    %c48 = arith.constant 48 : index
    %c0_3 = arith.constant 0 : index
    %3 = vector.load %arg1[%c48, %c0_3] : memref<64x512xf32, #tpu.memory_space<vmem>>, vector<16x512xf32>
    %4 = vector.extract_strided_slice %0 {offsets = [3, 0], sizes = [1, 512], strides = [1, 1]} : vector<16x512xf32> to vector<1x512xf32>
    %5 = vector.extract_strided_slice %1 {offsets = [3, 0], sizes = [1, 512], strides = [1, 1]} : vector<16x512xf32> to vector<1x512xf32>
    %6 = vector.extract_strided_slice %2 {offsets = [3, 0], sizes = [1, 512], strides = [1, 1]} : vector<16x512xf32> to vector<1x512xf32>
    %7 = vector.extract_strided_slice %3 {offsets = [3, 0], sizes = [1, 512], strides = [1, 1]} : vector<16x512xf32> to vector<1x512xf32>
    %c0_4 = arith.constant 0 : index
    %c0_5 = arith.constant 0 : index
    %8 = vector.load %arg3[%c0_4, %c0_5] : memref<128x56xf32, #tpu.memory_space<vmem>>, vector<128x56xf32>
    %c0_6 = arith.constant 0 : index
    %c0_7 = arith.constant 0 : index
    %9 = vector.load %arg4[%c0_6, %c0_7] : memref<16x128xf32, #tpu.memory_space<vmem>>, vector<16x128xf32>
    %c0_8 = arith.constant 0 : index
    %c0_9 = arith.constant 0 : index
    %10 = vector.load %arg2[%c0_8, %c0_9] : memref<8x512xf32, #tpu.memory_space<vmem>>, vector<8x512xf32>
    %c0_10 = arith.constant 0 : index
    %c0_11 = arith.constant 0 : index
    %11 = vector.load %arg0[%c0_10, %c0_11] : memref<16x512xf32, #tpu.memory_space<vmem>>, vector<16x512xf32>
    %c0_i32 = arith.constant 0 : i32
    %12 = vector.extract_strided_slice %11 {offsets = [3, 0], sizes = [1, 512], strides = [1, 1]} : vector<16x512xf32> to vector<1x512xf32>
    %13 = vector.extract_strided_slice %12 {offsets = [0, 1], sizes = [1, 511], strides = [1, 1]} : vector<1x512xf32> to vector<1x511xf32>
    %14 = vector.extract_strided_slice %12 {offsets = [0, 0], sizes = [1, 1], strides = [1, 1]} : vector<1x512xf32> to vector<1x1xf32>
    %15 = tpu.concatenate %13, %14 in 1 : vector<1x511xf32>, vector<1x1xf32> -> vector<1x512xf32>
    %16 = arith.mulf %15, %4 : vector<1x512xf32>
    %17 = vector.extract_strided_slice %12 {offsets = [0, 511], sizes = [1, 1], strides = [1, 1]} : vector<1x512xf32> to vector<1x1xf32>
    %18 = vector.extract_strided_slice %12 {offsets = [0, 0], sizes = [1, 511], strides = [1, 1]} : vector<1x512xf32> to vector<1x511xf32>
    %19 = tpu.concatenate %17, %18 in 1 : vector<1x1xf32>, vector<1x511xf32> -> vector<1x512xf32>
    %20 = arith.mulf %19, %5 : vector<1x512xf32>
    %21 = arith.maximumf %16, %20 : vector<1x512xf32>
    %22 = arith.maximumf %12, %21 : vector<1x512xf32>
    %23 = vector.extract_strided_slice %22 {offsets = [0, 16], sizes = [1, 496], strides = [1, 1]} : vector<1x512xf32> to vector<1x496xf32>
    %24 = vector.extract_strided_slice %22 {offsets = [0, 0], sizes = [1, 16], strides = [1, 1]} : vector<1x512xf32> to vector<1x16xf32>
    %25 = tpu.concatenate %23, %24 in 1 : vector<1x496xf32>, vector<1x16xf32> -> vector<1x512xf32>
    %26 = arith.mulf %25, %6 : vector<1x512xf32>
    %27 = vector.extract_strided_slice %22 {offsets = [0, 496], sizes = [1, 16], strides = [1, 1]} : vector<1x512xf32> to vector<1x16xf32>
    %28 = vector.extract_strided_slice %22 {offsets = [0, 0], sizes = [1, 496], strides = [1, 1]} : vector<1x512xf32> to vector<1x496xf32>
    %29 = tpu.concatenate %27, %28 in 1 : vector<1x16xf32>, vector<1x496xf32> -> vector<1x512xf32>
    %30 = arith.mulf %29, %7 : vector<1x512xf32>
    %31 = arith.maximumf %26, %30 : vector<1x512xf32>
    %32 = arith.maximumf %22, %31 : vector<1x512xf32>
    %cst = arith.constant 1.000000e-01 : f32
    %33 = vector.broadcast %cst : f32 to vector<1x512xf32>
    %34 = arith.cmpf ogt, %32, %33 : vector<1x512xf32>
    %35 = vector.extract_strided_slice %11 {offsets = [0, 1], sizes = [16, 511], strides = [1, 1]} : vector<16x512xf32> to vector<16x511xf32>
    %36 = vector.extract_strided_slice %11 {offsets = [0, 0], sizes = [16, 1], strides = [1, 1]} : vector<16x512xf32> to vector<16x1xf32>
    %37 = tpu.concatenate %35, %36 in 1 : vector<16x511xf32>, vector<16x1xf32> -> vector<16x512xf32>
    %38 = arith.mulf %37, %0 : vector<16x512xf32>
    %39 = vector.extract_strided_slice %11 {offsets = [0, 511], sizes = [16, 1], strides = [1, 1]} : vector<16x512xf32> to vector<16x1xf32>
    %40 = vector.extract_strided_slice %11 {offsets = [0, 0], sizes = [16, 511], strides = [1, 1]} : vector<16x512xf32> to vector<16x511xf32>
    %41 = tpu.concatenate %39, %40 in 1 : vector<16x1xf32>, vector<16x511xf32> -> vector<16x512xf32>
    %42 = arith.mulf %41, %1 : vector<16x512xf32>
    %43 = arith.subf %38, %42 : vector<16x512xf32>
    %44 = arith.addf %38, %11 : vector<16x512xf32>
    %45 = arith.addf %44, %11 : vector<16x512xf32>
    %46 = arith.addf %45, %42 : vector<16x512xf32>
    %47 = vector.extract_strided_slice %43 {offsets = [0, 496], sizes = [16, 16], strides = [1, 1]} : vector<16x512xf32> to vector<16x16xf32>
    %48 = vector.extract_strided_slice %43 {offsets = [0, 0], sizes = [16, 496], strides = [1, 1]} : vector<16x512xf32> to vector<16x496xf32>
    %49 = tpu.concatenate %47, %48 in 1 : vector<16x16xf32>, vector<16x496xf32> -> vector<16x512xf32>
    %50 = arith.mulf %49, %3 : vector<16x512xf32>
    %51 = arith.addf %50, %43 : vector<16x512xf32>
    %52 = arith.addf %51, %43 : vector<16x512xf32>
    %53 = vector.extract_strided_slice %43 {offsets = [0, 16], sizes = [16, 496], strides = [1, 1]} : vector<16x512xf32> to vector<16x496xf32>
    %54 = vector.extract_strided_slice %43 {offsets = [0, 0], sizes = [16, 16], strides = [1, 1]} : vector<16x512xf32> to vector<16x16xf32>
    %55 = tpu.concatenate %53, %54 in 1 : vector<16x496xf32>, vector<16x16xf32> -> vector<16x512xf32>
    %56 = arith.mulf %55, %2 : vector<16x512xf32>
    %57 = arith.addf %52, %56 : vector<16x512xf32>
    %cst_12 = arith.constant 1.250000e-01 : f32
    %58 = vector.broadcast %cst_12 : f32 to vector<16x512xf32>
    %59 = arith.mulf %57, %58 : vector<16x512xf32>
    %60 = vector.extract_strided_slice %46 {offsets = [0, 16], sizes = [16, 496], strides = [1, 1]} : vector<16x512xf32> to vector<16x496xf32>
    %61 = vector.extract_strided_slice %46 {offsets = [0, 0], sizes = [16, 16], strides = [1, 1]} : vector<16x512xf32> to vector<16x16xf32>
    %62 = tpu.concatenate %60, %61 in 1 : vector<16x496xf32>, vector<16x16xf32> -> vector<16x512xf32>
    %63 = arith.mulf %62, %2 : vector<16x512xf32>
    %64 = vector.extract_strided_slice %46 {offsets = [0, 496], sizes = [16, 16], strides = [1, 1]} : vector<16x512xf32> to vector<16x16xf32>
    %65 = vector.extract_strided_slice %46 {offsets = [0, 0], sizes = [16, 496], strides = [1, 1]} : vector<16x512xf32> to vector<16x496xf32>
    %66 = tpu.concatenate %64, %65 in 1 : vector<16x16xf32>, vector<16x496xf32> -> vector<16x512xf32>
    %67 = arith.mulf %66, %3 : vector<16x512xf32>
    %68 = arith.subf %63, %67 : vector<16x512xf32>
    %cst_13 = arith.constant 1.250000e-01 : f32
    %69 = vector.broadcast %cst_13 : f32 to vector<16x512xf32>
    %70 = arith.mulf %68, %69 : vector<16x512xf32>
    %71 = tpu.concatenate %11, %59, %70, %10 in 0 : vector<16x512xf32>, vector<16x512xf32>, vector<16x512xf32>, vector<8x512xf32> -> vector<56x512xf32>
    %cst_14 = arith.constant dense<0.000000e+00> : vector<128x512xf32>
    %72 = tpu.matmul %8, %71, %cst_14 {dimension_numbers = #tpu.dot_dimension_numbers<[1], [0], [0], [1], [0, 0, 1, 1], [], []>} : vector<128x56xf32>, vector<56x512xf32>, vector<128x512xf32> -> vector<128x512xf32>
    %cst_15 = arith.constant 0.000000e+00 : f32
    %73 = vector.broadcast %cst_15 : f32 to vector<128x512xf32>
    %74 = arith.maximumf %72, %73 : vector<128x512xf32>
    %cst_16 = arith.constant dense<0.000000e+00> : vector<16x512xf32>
    %75 = tpu.matmul %9, %74, %cst_16 {dimension_numbers = #tpu.dot_dimension_numbers<[1], [0], [0], [1], [0, 0, 1, 1], [], []>} : vector<16x128xf32>, vector<128x512xf32>, vector<16x512xf32> -> vector<16x512xf32>
    %76 = arith.index_cast %c0_i32 : i32 to index
    %c0_17 = arith.constant 0 : index
    %c0_18 = arith.constant 0 : index
    %77 = vector.load %arg5[%76, %c0_17, %c0_18] : memref<1x1x512xf32, #tpu.memory_space<vmem>>, vector<1x1x512xf32>
    %78 = vector.shape_cast %77 : vector<1x1x512xf32> to vector<1x512xf32>
    %79 = vector.broadcast %78 : vector<1x512xf32> to vector<16x512xf32>
    %80 = arith.mulf %75, %79 : vector<16x512xf32>
    %81 = arith.addf %11, %80 : vector<16x512xf32>
    %82 = vector.extract_strided_slice %81 {offsets = [3, 0], sizes = [1, 512], strides = [1, 1]} : vector<16x512xf32> to vector<1x512xf32>
    %83 = vector.extract_strided_slice %82 {offsets = [0, 1], sizes = [1, 511], strides = [1, 1]} : vector<1x512xf32> to vector<1x511xf32>
    %84 = vector.extract_strided_slice %82 {offsets = [0, 0], sizes = [1, 1], strides = [1, 1]} : vector<1x512xf32> to vector<1x1xf32>
    %85 = tpu.concatenate %83, %84 in 1 : vector<1x511xf32>, vector<1x1xf32> -> vector<1x512xf32>
    %86 = arith.mulf %85, %4 : vector<1x512xf32>
    %87 = vector.extract_strided_slice %82 {offsets = [0, 511], sizes = [1, 1], strides = [1, 1]} : vector<1x512xf32> to vector<1x1xf32>
    %88 = vector.extract_strided_slice %82 {offsets = [0, 0], sizes = [1, 511], strides = [1, 1]} : vector<1x512xf32> to vector<1x511xf32>
    %89 = tpu.concatenate %87, %88 in 1 : vector<1x1xf32>, vector<1x511xf32> -> vector<1x512xf32>
    %90 = arith.mulf %89, %5 : vector<1x512xf32>
    %91 = arith.maximumf %86, %90 : vector<1x512xf32>
    %92 = arith.maximumf %82, %91 : vector<1x512xf32>
    %93 = vector.extract_strided_slice %92 {offsets = [0, 16], sizes = [1, 496], strides = [1, 1]} : vector<1x512xf32> to vector<1x496xf32>
    %94 = vector.extract_strided_slice %92 {offsets = [0, 0], sizes = [1, 16], strides = [1, 1]} : vector<1x512xf32> to vector<1x16xf32>
    %95 = tpu.concatenate %93, %94 in 1 : vector<1x496xf32>, vector<1x16xf32> -> vector<1x512xf32>
    %96 = arith.mulf %95, %6 : vector<1x512xf32>
    %97 = vector.extract_strided_slice %92 {offsets = [0, 496], sizes = [1, 16], strides = [1, 1]} : vector<1x512xf32> to vector<1x16xf32>
    %98 = vector.extract_strided_slice %92 {offsets = [0, 0], sizes = [1, 496], strides = [1, 1]} : vector<1x512xf32> to vector<1x496xf32>
    %99 = tpu.concatenate %97, %98 in 1 : vector<1x16xf32>, vector<1x496xf32> -> vector<1x512xf32>
    %100 = arith.mulf %99, %7 : vector<1x512xf32>
    %101 = arith.maximumf %96, %100 : vector<1x512xf32>
    %102 = arith.maximumf %92, %101 : vector<1x512xf32>
    %cst_19 = arith.constant 1.000000e-01 : f32
    %103 = vector.broadcast %cst_19 : f32 to vector<1x512xf32>
    %104 = arith.cmpf ogt, %102, %103 : vector<1x512xf32>
    %105 = arith.andi %34, %104 : vector<1x512xi1>
    %106 = arith.extui %105 : vector<1x512xi1> to vector<1x512xi32>
    %107 = arith.sitofp %106 : vector<1x512xi32> to vector<1x512xf32>
    %108 = vector.broadcast %107 : vector<1x512xf32> to vector<16x512xf32>
    %109 = arith.mulf %81, %108 : vector<16x512xf32>
    %c1_i32 = arith.constant 1 : i32
    %c0_20 = arith.constant 0 : index
    %c0_21 = arith.constant 0 : index
    %110 = vector.load %arg6[%c0_20, %c0_21] : memref<16x512xf32, #tpu.memory_space<vmem>>, vector<16x512xf32>
    tpu.vector_store %arg6[%c0_20, %c0_21], %109 {strides = array<i32>} : memref<16x512xf32, #tpu.memory_space<vmem>>, vector<16x512xf32>,
    return
  }
}

</mosaic_0001>

<bundles_post_ra>
// kernel: tpu_custom_call.1
= control target key start
LH: loop header
LB: loop body
LE: loop exit
PB: predicated region body
PF: predicated region fallthrough
CT: control target
= control target key end

     0   :  { %11 = vsyncpa [#allocation3], 0  ;;  %s2220_s0 = inlined_call_operand.vmem [shape: f32[16,512], index: 0, kind: input, shape index: {}]   ;;  %s2221_s1 = inlined_call_operand.hbm [shape: f32[64,512], index: 1, kind: input, shape index: {}]   ;;  %s2222_s2 = inlined_call_operand.vmem [shape: f32[8,512], index: 2, kind: input, shape index: {}]   ;;  %s2223_s3 = inlined_call_operand.vmem [shape: f32[128,56], index: 3, kind: input, shape index: {}]   ;;  %s2224_s4 = inlined_call_operand.vmem [shape: f32[16,128], index: 4, kind: input, shape index: {}]   ;;  %s2225_s5 = inlined_call_operand.vmem [shape: f32[1,1,512], index: 5, kind: input, shape index: {}]   ;;  %s2226_s6 = inlined_call_operand.hbm [shape: f32[16,512], index: 6, kind: output, shape index: {}]  }
   0x1   :  { %12 = vsyncpa [#allocation4], 0  ;;  %s19_s23 = sshll.u32 %s2221_s1, 4  ;;  %s1330_s24 = smov [#allocation2]   ;;  %s20_s23 = int_to_ptr.hbm [resolvable:$true] %s19_s23 }
   0x2   :  { %s21_s25 = sshll.u32 %s1330_s24, 4  ;;  %s1331_s26 = smov 512   ;;  %s22_s25 = int_to_ptr.vmem [resolvable:$true] %s21_s25 }
   0x3   :  { %s1332_s27 = smov 32  }
   0x4   :  { %27 = dma.hbm_to_vmem [thread:$0]  %s20_s23, 4096, %s22_s25, [#allocation3], %s1331_s26, %s1331_s26, %s1332_s27  }
   0x5   :  { %1326 = dma.done.wait [#allocation3], 4096  }
   0x6   :  { %1327 = vsyncadd [#allocation3], 4294963200  ;;  %v1383_v0 = vld [vmem:[%s2220_s0 + $0x30] sm:$0xff]  ;;  %v1388_v1 = vld [vmem:[%s2220_s0 + $0x20] sm:$0xff]  ;;  %s1333_s1 = smov 127   ;;  %s1334_s20 = smov 1  }
   0x7   :  { %226 = vrot.lane.b32.xlu1 %v1383_v0, %s1333_s1  ;;  %222 = vrot.lane.b32.xlu0 %v1388_v1, %s1333_s1  ;;  %v1397_v2 = vld [vmem:[%s2220_s0] sm:$0xff]  ;;  %v1404_v3 = vld [vmem:[%s2220_s0 + $0x38] sm:$0xff]  ;;  %vm137_vm0 = vcmask 7168   ;;  %vm114_vm1 = vcmask 1039360   ;;  %s1335_s21 = smov 16   ;;  %v46_v25 = vld [vmem:[#allocation2 + $0x30] sm:$0xff] }
   0x8   :  { %106 = vrot.lane.b32.xlu2 %v1397_v2, %s1333_s1  ;;  %v1409_v4 = vld [vmem:[%s2220_s0 + $0x28] sm:$0xff]  ;;  %v1425_v6 = vld [vmem:[%s2220_s0 + $0x18] sm:$0xff]  ;;  %v1430_v7 = vld [vmem:[%s2220_s0 + $0x10] sm:$0xff]  ;;  %s1336_s22 = smov 112   ;;  %vm170_vm2 = vcmask 916480   ;;  %vm193_vm3 = vcmask 130048  }
   0x9   :  { %v1414_v5 = vld [vmem:[%s2220_s0 + $0x8] sm:$0xff]  ;;  %v55_v14 = vld [vmem:[#allocation2 + $0x78] sm:$0xff]  ;;  %v54_v29 = vld [vmem:[#allocation2 + $0x70] sm:$0xff]  ;;  %vm528_vm4 = vcmask 457728   ;;  %s1338_s15 = smov [#allocation5]   ;;  %s1169_s19 = sshll.u32 %s2226_s6, 4  ;;  %s1170_s19 = int_to_ptr.hbm [resolvable:$true] %s1169_s19 }
   0xa   :  { %v47_v16 = vld [vmem:[#allocation2 + $0x38] sm:$0xff]  ;;  %v45_v27 = vld [vmem:[#allocation2 + $0x28] sm:$0xff]  ;;  %v48_v44 = vld [vmem:[#allocation2 + $0x40] sm:$0xff]  ;;  %s1167_s16 = sshll.u32 %s1338_s15, 4  ;;  %s1168_s16 = int_to_ptr.vmem [resolvable:$true] %s1167_s16 }
   0xb   :  { %v53_v30 = vld [vmem:[#allocation2 + $0x68] sm:$0xff]  ;;  %v40_v46 = vld [vmem:[#allocation2] sm:$0xff]  ;;  %v43_v59 = vld [vmem:[#allocation2 + $0x18] sm:$0xff] }
   0xc   :  { %v41_v42 = vld [vmem:[#allocation2 + $0x8] sm:$0xff]  ;;  %v42_v61 = vld [vmem:[#allocation2 + $0x10] sm:$0xff] }
   0xd   :  { %v49_v45 = vld [vmem:[#allocation2 + $0x48] sm:$0xff]  ;;  %v50_v63 = vld [vmem:[#allocation2 + $0x50] sm:$0xff] }
   0xf   :  { %228 = vrot.lane.b32.xlu1 %v1404_v3, %s1333_s1  ;;  %224 = vrot.lane.b32.xlu0 %v1409_v4, %s1333_s1 }
  0x10   :  { %108 = vrot.lane.b32.xlu2 %v1414_v5, %s1333_s1 }
  0x17   :  { %112 = vrot.lane.b32.xlu1 %v1425_v6, %s1333_s1  ;;  %110 = vrot.lane.b32.xlu0 %v1430_v7, %s1333_s1 }
  0x18   :  { %243 = vrot.lane.b32.xlu2 %v1404_v3, %s1334_s20 }
  0x1f   :  { %248 = vrot.lane.b32.xlu1 %v1409_v4, %s1334_s20  ;;  %246 = vrot.lane.b32.xlu0 %v1388_v1, %s1334_s20 }
  0x20   :  { %250 = vrot.lane.b32.xlu2 %v1383_v0, %s1334_s20 }
  0x27   :  { %128 = vrot.lane.b32.xlu0 %v1425_v6, %s1334_s20  ;;  %131 = vrot.lane.b32.xlu1 %v1397_v2, %s1334_s20 }
  0x28   :  { %133 = vrot.lane.b32.xlu2 %v1414_v5, %s1334_s20 }
  0x2f   :  { %135 = vrot.lane.b32.xlu0 %v1430_v7, %s1334_s20 }
  0x62   :  { %v107_v8 = vpop.permute.xlu2 %106 }
  0x6a   :  { %v109_v9 = vpop.permute.xlu2 %108 }
  0x6b   :  { %v115_v47 = vsel %vm114_vm1, %v107_v8, %v109_v9 }
  0x6c   :  { %v1501_v55 = vmul.f32 %v115_v47, %v40_v46 }
  0x6e   :  { %2249 = vst [vmem:[#allocation11_spill] sm:$0xff] %v1501_v55 }
  0x72   :  { %v1452_v10 = vpop.permute.xlu2 %243 }
  0x79   :  { %v227_v11 = vpop.permute.xlu1 %226  ;;  %v1454_v12 = vpop.permute.xlu0 %222 }
  0x7a   :  { %v251_v13 = vpop.permute.xlu2 %250 }
  0x7b   :  { %v254_v15 = vsel %vm137_vm0, %v251_v13, %v1452_v10 }
  0x7c   :  { %v1462_v20 = vmul.f32 %v254_v15, %v55_v14 }
  0x81   :  { %v229_v17 = vpop.permute.xlu1 %228  ;;  %v1458_v18 = vpop.permute.xlu0 %224 }
  0x82   :  { %v238_v19 = vsel %vm114_vm1, %v229_v17, %v1454_v12  ;;  %v232_v26 = vsel %vm114_vm1, %v227_v11, %v229_v17  ;;  %v231_v28 = vsel %vm114_vm1, %v1458_v18, %v227_v11  ;;  %v134_v41 = vpop.permute.xlu2 %133 }
  0x83   :  { %v1464_v21 = vmul.f32 %v238_v19, %v47_v16  ;;  %v241_v35 = vmul.f32 %v232_v26, %v46_v25  ;;  %v1477_v36 = vmul.f32 %v231_v28, %v45_v27  ;;  %v44_v28 = vld [vmem:[#allocation2 + $0x20] sm:$0xff]  ;;  %v58_v26 = vld [vmem:[#allocation2 + $0x90] sm:$0xff] }
  0x85   :  { %v1468_v22 = vsub.f32 %v1464_v21, %v1462_v20 }
  0x87   :  { %300 = vrot.lane.b32.xlu1 %v1468_v22, %s1335_s21 }
  0x89   :  { %v113_v23 = vpop.permute.xlu1 %112  ;;  %v111_v24 = vpop.permute.xlu0 %110 }
  0x8a   :  { %v116_v43 = vsel %vm114_vm1, %v109_v9, %v111_v24  ;;  %v123_v60 = vsel %vm114_vm1, %v113_v23, %v107_v8  ;;  %v117_v62 = vsel %vm114_vm1, %v111_v24, %v113_v23  ;;  %v51_v9 = vld [vmem:[#allocation2 + $0x58] sm:$0xff]  ;;  %v52_v24 = vld [vmem:[#allocation2 + $0x60] sm:$0xff] }
  0x8b   :  { %v1495_v52 = vmul.f32 %v116_v43, %v41_v42  ;;  %v1517_v15 = vmul.f32 %v123_v60, %v43_v59  ;;  %v1519_v16 = vmul.f32 %v117_v62, %v42_v61  ;;  %v272_v59 = vadd.f32 %v1501_v55, %v1397_v2 }
  0x8d   :  { %2246 = vst [vmem:[#allocation8_spill] sm:$0xff] %v1495_v52  ;;  %v273_v47 = vadd.f32 %v1495_v52, %v1414_v5  ;;  %v280_v60 = vadd.f32 %v272_v59, %v1397_v2  ;;  %v66_v59 = vld [vmem:[#allocation2 + $0xd0] sm:$0xff] }
  0x8e   :  { %2250 = vst [vmem:[#allocation12_spill] sm:$0xff] %v1517_v15 }
  0x8f   :  { %2251 = vst [vmem:[#allocation13_spill] sm:$0xff] %v1519_v16 }
  0x91   :  { %v249_v31 = vpop.permute.xlu1 %248  ;;  %v247_v32 = vpop.permute.xlu0 %246 }
  0x92   :  { %v253_v33 = vsel %vm137_vm0, %v249_v31, %v251_v13  ;;  %v252_v34 = vsel %vm137_vm0, %v247_v32, %v249_v31  ;;  %v259_v25 = vsel %vm137_vm0, %v1452_v10, %v247_v32  ;;  %v278_v32 = vadd.f32 %v241_v35, %v1383_v0 }
  0x93   :  { %v262_v37 = vmul.f32 %v253_v33, %v54_v29  ;;  %v1479_v38 = vmul.f32 %v252_v34, %v53_v30  ;;  %v230_v29 = vsel %vm114_vm1, %v1454_v12, %v1458_v18  ;;  %v260_v10 = vmul.f32 %v259_v25, %v52_v24 }
  0x94   :  { %v239_v30 = vmul.f32 %v230_v29, %v44_v28  ;;  %v286_v12 = vadd.f32 %v278_v32, %v1383_v0  ;;  %v279_v18 = vadd.f32 %v1464_v21, %v1404_v3  ;;  %v92_v28 = vld [vmem:[%s2222_s2 + $0x10] sm:$0xff]  ;;  %v93_v32 = vld [vmem:[%s2222_s2 + $0x18] sm:$0xff] }
  0x95   :  { %v1481_v39 = vsub.f32 %v241_v35, %v262_v37  ;;  %v1485_v40 = vsub.f32 %v1477_v36, %v1479_v38  ;;  %v277_v35 = vadd.f32 %v1477_v36, %v1409_v4  ;;  %v274_v36 = vadd.f32 %v1519_v16, %v1430_v7  ;;  %716 = vmatpush.msra.mxu2 %v92_v28 }
  0x96   :  { %v1548_v31 = vsub.f32 %v239_v30, %v260_v10  ;;  %v294_v34 = vadd.f32 %v286_v12, %v262_v37  ;;  %v276_v37 = vadd.f32 %v239_v30, %v1388_v1  ;;  %781 = vmatpush.msra.mxu3 %v93_v32 }
  0x97   :  { %320 = vrot.lane.b32.xlu0 %v1481_v39, %s1335_s21  ;;  %318 = vrot.lane.b32.xlu2 %v1485_v40, %s1335_s21  ;;  %v285_v21 = vadd.f32 %v277_v35, %v1409_v4 }
  0x99   :  { %v129_v48 = vpop.permute.xlu0 %128  ;;  %v132_v49 = vpop.permute.xlu1 %131  ;;  %v293_v43 = vadd.f32 %v285_v21, %v1479_v38  ;;  %v275_v38 = vadd.f32 %v1517_v15, %v1425_v6 }
  0x9a   :  { %v145_v50 = vsel %vm137_vm0, %v129_v48, %v132_v49  ;;  %v138_v51 = vsel %vm137_vm0, %v132_v49, %v134_v41  ;;  %v281_v49 = vadd.f32 %v273_v47, %v1414_v5 }
  0x9b   :  { %v1497_v53 = vmul.f32 %v145_v50, %v48_v44  ;;  %v1499_v54 = vmul.f32 %v138_v51, %v49_v45  ;;  %v284_v44 = vadd.f32 %v276_v37, %v1388_v1  ;;  %v282_v45 = vadd.f32 %v274_v36, %v1430_v7 }
  0x9d   :  { %2247 = vst [vmem:[#allocation9_spill] sm:$0xff] %v1497_v53  ;;  %v1505_v56 = vsub.f32 %v1495_v52, %v1499_v54  ;;  %v1562_v33 = vsub.f32 %v1501_v55, %v1497_v53  ;;  %v292_v46 = vadd.f32 %v284_v44, %v260_v10  ;;  %v289_v51 = vadd.f32 %v281_v49, %v1499_v54 }
  0x9e   :  { %2248 = vst [vmem:[#allocation10_spill] sm:$0xff] %v1499_v54  ;;  %v288_v61 = vadd.f32 %v280_v60, %v1497_v53 }
  0x9f   :  { %312 = vrot.lane.b32.xlu2 %v1505_v56, %s1335_s21 }
  0xa1   :  { %v136_v11 = vpop.permute.xlu0 %135 }
  0xa2   :  { %v139_v13 = vsel %vm137_vm0, %v134_v41, %v136_v11  ;;  %v140_v14 = vsel %vm137_vm0, %v136_v11, %v129_v48  ;;  %v287_v41 = vadd.f32 %v279_v18, %v1404_v3  ;;  %v283_v48 = vadd.f32 %v275_v38, %v1425_v6 }
  0xa3   :  { %v1521_v17 = vmul.f32 %v139_v13, %v50_v63  ;;  %v1523_v19 = vmul.f32 %v140_v14, %v51_v9 }
  0xa4   :  { %v295_v42 = vadd.f32 %v287_v41, %v1462_v20 }
  0xa5   :  { %2252 = vst [vmem:[#allocation14_spill] sm:$0xff] %v1521_v17  ;;  %v1527_v8 = vsub.f32 %v1519_v16, %v1521_v17  ;;  %v1531_v23 = vsub.f32 %v1517_v15, %v1523_v19  ;;  %v290_v20 = vadd.f32 %v282_v45, %v1521_v17  ;;  %v291_v50 = vadd.f32 %v283_v48, %v1523_v19  ;;  %v70_v45 = vld [vmem:[#allocation2 + $0xf0] sm:$0xff] }
  0xa6   :  { %2253 = vst [vmem:[#allocation15_spill] sm:$0xff] %v1523_v19 }
  0xa7   :  { %298 = vrot.lane.b32.xlu1 %v1531_v23, %s1335_s21  ;;  %314 = vrot.lane.b32.xlu0 %v1527_v8, %s1335_s21 }
  0xa8   :  { %374 = vrot.lane.b32.xlu2 %v1481_v39, %s1336_s22 }
  0xaf   :  { %370 = vrot.lane.b32.xlu1 %v1548_v31, %s1336_s22  ;;  %376 = vrot.lane.b32.xlu0 %v1468_v22, %s1336_s22 }
  0xb0   :  { %366 = vrot.lane.b32.xlu2 %v1527_v8, %s1336_s22 }
  0xb7   :  { %368 = vrot.lane.b32.xlu0 %v1531_v23, %s1336_s22  ;;  %362 = vrot.lane.b32.xlu1 %v1562_v33, %s1336_s22 }
  0xb8   :  { %440 = vrot.lane.b32.xlu2 %v294_v34, %s1336_s22 }
  0xbf   :  { %442 = vrot.lane.b32.xlu0 %v295_v42, %s1336_s22  ;;  %316 = vrot.lane.b32.xlu1 %v1548_v31, %s1335_s21 }
  0xc0   :  { %484 = vrot.lane.b32.xlu2 %v293_v43, %s1335_s21 }
  0xc7   :  { %486 = vrot.lane.b32.xlu0 %v294_v34, %s1335_s21  ;;  %436 = vrot.lane.b32.xlu1 %v292_v46, %s1336_s22 }
  0xc8   :  { %432 = vrot.lane.b32.xlu2 %v290_v20, %s1336_s22 }
  0xcf   :  { %434 = vrot.lane.b32.xlu0 %v291_v50, %s1336_s22  ;;  %472 = vrot.lane.b32.xlu1 %v295_v42, %s1335_s21  ;;  %v90_v42 = vld [vmem:[%s2222_s2] sm:$0xff] }
  0xd0   :  { %478 = vrot.lane.b32.xlu2 %v289_v51, %s1335_s21  ;;  %586 = vmatpush.msra.mxu0 %v90_v42  ;;  %v71_v42 = vld [vmem:[#allocation2 + $0xf8] sm:$0xff] }
  0xd7   :  { %480 = vrot.lane.b32.xlu0 %v290_v20, %s1335_s21  ;;  %428 = vrot.lane.b32.xlu1 %v288_v61, %s1336_s22 }
  0xd8   :  { %438 = vrot.lane.b32.xlu2 %v293_v43, %s1336_s22  ;;  %v91_v43 = vld [vmem:[%s2222_s2 + $0x8] sm:$0xff] }
  0xd9   :  { %651 = vmatpush.msra.mxu1 %v91_v43  ;;  %v63_v43 = vld [vmem:[#allocation2 + $0xb8] sm:$0xff] }
  0xdf   :  { %482 = vrot.lane.b32.xlu0 %v292_v46, %s1335_s21  ;;  %470 = vrot.lane.b32.xlu1 %v291_v50, %s1335_s21  ;;  %v62_v46 = vld [vmem:[#allocation2 + $0xb0] sm:$0xff] }
  0xe0   :  { %430 = vrot.lane.b32.xlu2 %v289_v51, %s1336_s22 }
  0xe7   :  { %476 = vrot.lane.b32.xlu0 %v288_v61, %s1335_s21  ;;  %310 = vrot.lane.b32.xlu1 %v1562_v33, %s1335_s21 }
  0xe8   :  { %364 = vrot.lane.b32.xlu2 %v1505_v56, %s1336_s22 }
  0xef   :  { %372 = vrot.lane.b32.xlu1 %v1485_v40, %s1336_s22 }
  0xf1   :  { %v1616_v62 = vpop.permute.xlu2 %318 }
  0xf9   :  { %v1618_v63 = vpop.permute.xlu2 %312  ;;  %v1622_v11 = vpop.permute.xlu1 %300 }
 0x102   :  { %v1620_v9 = vpop.permute.xlu2 %374 }
 0x109   :  { %v321_v13 = vpop.permute.xlu0 %320 }
 0x10a   :  { %v1624_v14 = vpop.permute.xlu2 %366  ;;  %v326_v51 = vsel %vm193_vm3, %v1616_v62, %v321_v13 }
 0x112   :  { %v1631_v29 = vpop.permute.xlu2 %440 }
 0x119   :  { %v1626_v24 = vpop.permute.xlu1 %298  ;;  %v315_v25 = vpop.permute.xlu0 %314 }
 0x11a   :  { %v1644_v34 = vpop.permute.xlu2 %484  ;;  %v323_v60 = vsel %vm193_vm3, %v1618_v63, %v315_v25 }
 0x121   :  { %v1633_v10 = vpop.permute.xlu1 %370  ;;  %v1635_v30 = vpop.permute.xlu0 %376 }
 0x122   :  { %v1648_v21 = vpop.permute.xlu2 %432  ;;  %v383_v27 = vsel %vm170_vm2, %v1620_v9, %v1635_v30 }
 0x129   :  { %v1640_v12 = vpop.permute.xlu0 %368  ;;  %v1642_v18 = vpop.permute.xlu1 %362 }
 0x12a   :  { %v1660_v49 = vpop.permute.xlu2 %478 }
 0x131   :  { %v443_v35 = vpop.permute.xlu0 %442  ;;  %v1646_v41 = vpop.permute.xlu1 %316 }
 0x132   :  { %v449_v37 = vsel %vm170_vm2, %v1631_v29, %v443_v35 }
 0x133   :  { %v468_v38 = vmul.f32 %v449_v37, %v62_v46 }
 0x139   :  { %v487_v36 = vpop.permute.xlu0 %486  ;;  %v437_v44 = vpop.permute.xlu1 %436 }
 0x13a   :  { %v492_v20 = vsel %vm193_vm3, %v1644_v34, %v487_v36  ;;  %v461_v61 = vsel %vm170_vm2, %v443_v35, %v437_v44  ;;  %v380_v35 = vsel %vm170_vm2, %v1624_v14, %v1640_v12 }
 0x13b   :  { %v510_v47 = vmul.f32 %v492_v20, %v70_v45  ;;  %v344_v20 = vmul.f32 %v326_v51, %v70_v45  ;;  %v327_v51 = vsel %vm193_vm3, %v321_v13, %v1622_v11 }
 0x13c   :  { %v345_v13 = vmul.f32 %v327_v51, %v71_v42  ;;  %v68_v51 = vld [vmem:[#allocation2 + $0xe0] sm:$0xff] }
 0x13d   :  { %v518_v48 = vsub.f32 %v468_v38, %v510_v47  ;;  %v340_v38 = vmul.f32 %v323_v60, %v66_v59  ;;  %v469_v47 = vmul.f32 %v461_v61, %v63_v43  ;;  %v1680_v60 = vld [vmem:[#allocation2 + $0xd8] sm:$0xff]  ;;  %v324_v61 = vsel %vm193_vm3, %v315_v25, %v1626_v24 }
 0x13e   :  { %2254 = vst [vmem:[#allocation16_spill] sm:$0xff] %v1680_v60  ;;  %v341_v17 = vmul.f32 %v324_v61, %v1680_v60  ;;  %v69_v61 = vld [vmem:[#allocation2 + $0xe8] sm:$0xff] }
 0x13f   :  { %v526_v50 = vmul.f32 0.125, %v518_v48  ;;  %v348_v57 = vadd.f32 %v340_v38, %v1527_v8 }
 0x141   :  { %v435_v28 = vpop.permute.xlu0 %434  ;;  %717 = vmatpush.msra.mxu2 %v526_v50  ;;  %v473_v32 = vpop.permute.xlu1 %472  ;;  %v352_v50 = vadd.f32 %v344_v20, %v1481_v39  ;;  %v356_v15 = vadd.f32 %v348_v57, %v1527_v8  ;;  %v353_v8 = vadd.f32 %v345_v13, %v1468_v22 }
 0x142   :  { %v493_v37 = vsel %vm193_vm3, %v487_v36, %v473_v32  ;;  %v439_v36 = vpop.permute.xlu2 %438  ;;  %v446_v45 = vsel %vm170_vm2, %v1648_v21, %v435_v28 }
 0x143   :  { %v511_v48 = vmul.f32 %v493_v37, %v71_v42  ;;  %v402_v37 = vmul.f32 %v383_v27, %v62_v46  ;;  %v464_v38 = vmul.f32 %v446_v45, %v58_v26  ;;  %v360_v19 = vadd.f32 %v352_v50, %v1481_v39 }
 0x144   :  { %v395_v27 = vsel %vm170_vm2, %v1635_v30, %v1633_v10  ;;  %v447_v39 = vsel %vm170_vm2, %v437_v44, %v439_v36  ;;  %v349_v42 = vadd.f32 %v341_v17, %v1531_v23 }
 0x145   :  { %v519_v58 = vsub.f32 %v469_v47, %v511_v48  ;;  %v398_v47 = vmul.f32 %v380_v35, %v58_v26  ;;  %v410_v46 = vadd.f32 %v402_v37, %v360_v19  ;;  %v1692_v35 = vld [vmem:[#allocation2 + $0xa8] sm:$0xff]  ;;  %v448_v26 = vsel %vm170_vm2, %v439_v36, %v1631_v29 }
 0x146   :  { %v403_v50 = vmul.f32 %v395_v27, %v63_v43  ;;  %v467_v19 = vmul.f32 %v448_v26, %v1692_v35  ;;  %v325_v26 = vsel %vm193_vm3, %v1646_v41, %v1616_v62  ;;  %v1739_v62 = vld [vmem:[%s2223_s3] sm:$0xff] }
 0x147   :  { %v527_v54 = vmul.f32 0.125, %v519_v58  ;;  %v418_v44 = vmul.f32 0.125, %v410_v46  ;;  %v357_v46 = vadd.f32 %v349_v42, %v1531_v23 }
 0x149   :  { %v481_v48 = vpop.permute.xlu0 %480  ;;  %782 = vmatpush.msra.mxu3 %v527_v54  ;;  %v429_v20 = vpop.permute.xlu1 %428  ;;  %v406_v54 = vadd.f32 %v398_v47, %v356_v15  ;;  %v394_v15 = vsel %vm170_vm2, %v1640_v12, %v1642_v18 }
 0x14a   :  { %v489_v58 = vsel %vm193_vm3, %v1660_v49, %v481_v48  ;;  %v460_v30 = vsel %vm170_vm2, %v435_v28, %v429_v20  ;;  %v431_v47 = vpop.permute.xlu2 %430 }
 0x14b   :  { %v506_v52 = vmul.f32 %v489_v58, %v66_v59  ;;  %v1696_v59 = vld [vmem:[#allocation2 + $0xa0] sm:$0xff]  ;;  %v414_v36 = vmul.f32 0.125, %v406_v54 }
 0x14c   :  { %v466_v17 = vmul.f32 %v447_v39, %v1696_v59  ;;  %v1724_v39 = vld [vmem:[#allocation2 + $0x88] sm:$0xff] }
 0x14d   :  { %v514_v25 = vsub.f32 %v464_v38, %v506_v52  ;;  %v1702_v52 = vld [vmem:[#allocation2 + $0x98] sm:$0xff]  ;;  %2256 = vst [vmem:[#allocation18_spill] sm:$0xff] %v1724_v39 }
 0x14e   :  { %2255 = vst [vmem:[#allocation17_spill] sm:$0xff] %v1702_v52  ;;  %v465_v12 = vmul.f32 %v460_v30, %v1702_v52  ;;  %v399_v27 = vmul.f32 %v394_v15, %v1702_v52 }
 0x14f   :  { %v522_v57 = vmul.f32 0.125, %v514_v25  ;;  %v361_v25 = vadd.f32 %v353_v8, %v1468_v22  ;;  %v444_v22 = vsel %vm170_vm2, %v429_v20, %v431_v47  ;;  %v1729_v8 = vld [vmem:[#allocation2 + $0x80] sm:$0xff] }
 0x150   :  { %2257 = vst [vmem:[#allocation19_spill] sm:$0xff] %v1729_v8 }
 0x151   :  { %v483_v29 = vpop.permute.xlu0 %482  ;;  %718 = vmatpush.msra.mxu2 %v522_v57  ;;  %v471_v45 = vpop.permute.xlu1 %470  ;;  %v445_v57 = vsel %vm170_vm2, %v431_v47, %v1648_v21  ;;  %v411_v23 = vadd.f32 %v403_v50, %v361_v25  ;;  %v343_v21 = vmul.f32 %v325_v26, %v69_v61 }
 0x152   :  { %v491_v28 = vsel %vm193_vm3, %v483_v29, %v1644_v34  ;;  %v503_v43 = vsel %vm193_vm3, %v473_v32, %v483_v29  ;;  %v490_v37 = vsel %vm193_vm3, %v481_v48, %v471_v45  ;;  %v337_v34 = vsel %vm193_vm3, %v1622_v11, %v1646_v41  ;;  %v1734_v29 = vld [vmem:[#allocation2 + $0xc8] sm:$0xff] }
 0x153   :  { %v508_v58 = vmul.f32 %v503_v43, %v68_v51  ;;  %v509_v38 = vmul.f32 %v491_v28, %v69_v61  ;;  %v507_v13 = vmul.f32 %v490_v37, %v1680_v60  ;;  %719 = vmatpush.msra.mxu2 %v418_v44  ;;  %v342_v15 = vmul.f32 %v337_v34, %v68_v51 }
 0x154   :  { %2259 = vst [vmem:[#allocation21_spill] sm:$0xff] %v1734_v29  ;;  %v407_v41 = vadd.f32 %v399_v27, %v357_v46  ;;  %v463_v20 = vmul.f32 %v445_v57, %v1724_v39  ;;  %v419_v61 = vmul.f32 0.125, %v411_v23  ;;  %v73_v46 = vld [vmem:[%s2223_s3 + $0x8] sm:$0xff] }
 0x155   :  { %720 = vmatpush.msra.mxu2 %v414_v36  ;;  %v517_v32 = vsub.f32 %v467_v19, %v509_v38  ;;  %v516_v48 = vsub.f32 %v466_v17, %v508_v58  ;;  %v515_v54 = vsub.f32 %v465_v12, %v507_v13  ;;  %v1732_v19 = vld [vmem:[#allocation2 + $0xc0] sm:$0xff]  ;;  %v350_v47 = vadd.f32 %v342_v15, %v1548_v31  ;;  %v365_v58 = vpop.permute.xlu2 %364 }
 0x156   :  { %2258 = vst [vmem:[#allocation20_spill] sm:$0xff] %v1732_v19  ;;  %v378_v34 = vsel %vm170_vm2, %v1642_v18, %v365_v58  ;;  %v80_v15 = vld [vmem:[%s2223_s3 + $0x40] sm:$0xff] }
 0x157   :  { %721 = vmatpush.msra.mxu2 %v1383_v0  ;;  %v525_v11 = vmul.f32 0.125, %v517_v32  ;;  %v524_v42 = vmul.f32 0.125, %v516_v48  ;;  %v523_v30 = vmul.f32 0.125, %v515_v54  ;;  %v462_v0 = vmul.f32 %v444_v22, %v1729_v8 }
 0x158   :  { %v379_v32 = vsel %vm170_vm2, %v365_v58, %v1624_v14  ;;  %v358_v54 = vadd.f32 %v350_v47, %v1548_v31  ;;  %v396_v31 = vmul.f32 %v378_v34, %v1729_v8 }
 0x159   :  { %652 = vmatpush.msra.mxu1 %v525_v11  ;;  %722 = vmatpush.msra.mxu2 %v1430_v7  ;;  %v477_v50 = vpop.permute.xlu0 %476  ;;  %v311_v44 = vpop.permute.xlu1 %310 }
 0x15a   :  { %v488_v36 = vsel %vm193_vm3, %v477_v50, %v1660_v49  ;;  %v502_v51 = vsel %vm193_vm3, %v471_v45, %v477_v50  ;;  %587 = vmatpush.msra.mxu0 %v524_v42  ;;  %783 = vmatpush.msra.mxu3 %v523_v30  ;;  %v322_v17 = vsel %vm193_vm3, %v311_v44, %v1618_v63  ;;  %v415_v45 = vmul.f32 0.125, %v407_v41  ;;  %v82_v41 = vld [vmem:[%s2223_s3 + $0x50] sm:$0xff] }
 0x15b   :  { %v504_v28 = vmul.f32 %v502_v51, %v1732_v19  ;;  %v505_v43 = vmul.f32 %v488_v36, %v1734_v29  ;;  %v336_v7 = vsel %vm193_vm3, %v1626_v24, %v311_v44  ;;  %v339_v37 = vmul.f32 %v322_v17, %v1734_v29  ;;  %1214 = vmatmul.msk.f32.vlgmr.msra.gmra.mxu2 %vm528_vm4, %v1739_v62  ;;  %v86_v50 = vld [vmem:[%s2223_s3 + $0x70] sm:$0xff]  ;;  %v87_v44 = vld [vmem:[%s2223_s3 + $0x78] sm:$0xff] }
 0x15c   :  { %v338_v49 = vmul.f32 %v336_v7, %v1732_v19  ;;  %784 = vmatpush.msra.mxu3 %v419_v61  ;;  %v351_v24 = vadd.f32 %v343_v21, %v1485_v40  ;;  %v83_v21 = vld [vmem:[%s2223_s3 + $0x58] sm:$0xff] }
 0x15d   :  { %v512_v63 = vsub.f32 %v462_v0, %v504_v28  ;;  %v513_v12 = vsub.f32 %v463_v20, %v505_v43  ;;  %v347_v13 = vadd.f32 %v339_v37, %v1505_v56  ;;  %v84_v20 = vld [vmem:[%s2223_s3 + $0x60] sm:$0xff]  ;;  %v85_v0 = vld [vmem:[%s2223_s3 + $0x68] sm:$0xff] }
 0x15e   :  { %v346_v38 = vadd.f32 %v338_v49, %v1562_v33  ;;  %785 = vmatpush.msra.mxu3 %v415_v45 }
 0x15f   :  { %v520_v27 = vmul.f32 0.125, %v512_v63  ;;  %v521_v25 = vmul.f32 0.125, %v513_v12  ;;  %v355_v18 = vadd.f32 %v347_v13, %v1505_v56 }
 0x160   :  { %786 = vmatpush.msra.mxu3 %v1404_v3  ;;  %v354_v57 = vadd.f32 %v346_v38, %v1562_v33 }
 0x161   :  { %588 = vmatpush.msra.mxu0 %v520_v27  ;;  %653 = vmatpush.msra.mxu1 %v521_v25  ;;  %v373_v48 = vpop.permute.xlu1 %372 }
 0x162   :  { %787 = vmatpush.msra.mxu3 %v1425_v6  ;;  %v381_v3 = vsel %vm170_vm2, %v1633_v10, %v373_v48  ;;  %v382_v26 = vsel %vm170_vm2, %v373_v48, %v1620_v9  ;;  %v359_v6 = vadd.f32 %v351_v24, %v1485_v40  ;;  %v397_v10 = vmul.f32 %v379_v32, %v1724_v39  ;;  %v75_v40 = vld [vmem:[%s2223_s3 + $0x18] sm:$0xff] }
 0x163   :  { %v400_v22 = vmul.f32 %v381_v3, %v1696_v59  ;;  %v401_v14 = vmul.f32 %v382_v26, %v1692_v35  ;;  %1215 = vmatmul.msk.f32.gmra.mxu2 %vm528_vm4, %v73_v46  ;;  %1230 = vmatmul.msk.f32.vlgmr.msra.gmra.mxu3 %vm528_vm4, %v1739_v62  ;;  %v404_v33 = vadd.f32 %v396_v31, %v354_v57  ;;  %v74_v35 = vld [vmem:[%s2223_s3 + $0x10] sm:$0xff] }
 0x164   :  { %v405_v11 = vadd.f32 %v397_v10, %v355_v18 }
 0x165   :  { %v408_v9 = vadd.f32 %v400_v22, %v358_v54  ;;  %v409_v23 = vadd.f32 %v401_v14, %v359_v6  ;;  %v412_v59 = vmul.f32 0.125, %v404_v33 }
 0x166   :  { %v413_v30 = vmul.f32 0.125, %v405_v11 }
 0x167   :  { %v416_v56 = vmul.f32 0.125, %v408_v9  ;;  %v417_v42 = vmul.f32 0.125, %v409_v23 }
 0x169   :  { %589 = vmatpush.msra.mxu0 %v416_v56  ;;  %654 = vmatpush.msra.mxu1 %v417_v42 }
 0x16b   :  { %1216 = vmatmul.msk.f32.gmra.mxu2 %vm528_vm4, %v74_v35  ;;  %1231 = vmatmul.msk.f32.gmra.mxu3 %vm528_vm4, %v73_v46 }
 0x16c   :  { %590 = vmatpush.msra.mxu0 %v412_v59  ;;  %655 = vmatpush.msra.mxu1 %v413_v30 }
 0x16e   :  { %591 = vmatpush.msra.mxu0 %v1388_v1  ;;  %656 = vmatpush.msra.mxu1 %v1409_v4  ;;  %v76_v1 = vld [vmem:[%s2223_s3 + $0x20] sm:$0xff]  ;;  %v78_v4 = vld [vmem:[%s2223_s3 + $0x30] sm:$0xff] }
 0x170   :  { %592 = vmatpush.msra.mxu0 %v1397_v2  ;;  %657 = vmatpush.msra.mxu1 %v1414_v5  ;;  %v77_v2 = vld [vmem:[%s2223_s3 + $0x28] sm:$0xff]  ;;  %v79_v5 = vld [vmem:[%s2223_s3 + $0x38] sm:$0xff] }
 0x171   :  { %1182 = vmatmul.msk.f32.vlgmr.msra.gmra.mxu0 %vm528_vm4, %v1739_v62  ;;  %1198 = vmatmul.msk.f32.vlgmr.msra.gmra.mxu1 %vm528_vm4, %v1739_v62  ;;  %v81_v62 = vld [vmem:[%s2223_s3 + $0x48] sm:$0xff] }
 0x173   :  { %1217 = vmatmul.msk.f32.gmra.mxu2 %vm528_vm4, %v75_v40  ;;  %1232 = vmatmul.msk.f32.gmra.mxu3 %vm528_vm4, %v74_v35 }
 0x179   :  { %1183 = vmatmul.msk.f32.gmra.mxu0 %vm528_vm4, %v73_v46  ;;  %1199 = vmatmul.msk.f32.gmra.mxu1 %vm528_vm4, %v73_v46 }
 0x17b   :  { %1218 = vmatmul.msk.f32.gmra.mxu2 %vm528_vm4, %v76_v1  ;;  %1233 = vmatmul.msk.f32.gmra.mxu3 %vm528_vm4, %v75_v40 }
 0x181   :  { %1184 = vmatmul.msk.f32.gmra.mxu0 %vm528_vm4, %v74_v35  ;;  %1200 = vmatmul.msk.f32.gmra.mxu1 %vm528_vm4, %v74_v35 }
 0x183   :  { %1219 = vmatmul.msk.f32.gmra.mxu2 %vm528_vm4, %v77_v2  ;;  %1234 = vmatmul.msk.f32.gmra.mxu3 %vm528_vm4, %v76_v1 }
 0x189   :  { %1185 = vmatmul.msk.f32.gmra.mxu0 %vm528_vm4, %v75_v40  ;;  %1201 = vmatmul.msk.f32.gmra.mxu1 %vm528_vm4, %v75_v40 }
 0x18b   :  { %1220 = vmatmul.msk.f32.gmra.mxu2 %vm528_vm4, %v78_v4  ;;  %1235 = vmatmul.msk.f32.gmra.mxu3 %vm528_vm4, %v77_v2 }
 0x191   :  { %1186 = vmatmul.msk.f32.gmra.mxu0 %vm528_vm4, %v76_v1  ;;  %1202 = vmatmul.msk.f32.gmra.mxu1 %vm528_vm4, %v76_v1 }
 0x193   :  { %1221 = vmatmul.msk.f32.gmra.mxu2 %vm528_vm4, %v79_v5  ;;  %1236 = vmatmul.msk.f32.gmra.mxu3 %vm528_vm4, %v78_v4 }
 0x199   :  { %1187 = vmatmul.msk.f32.gmra.mxu0 %vm528_vm4, %v77_v2  ;;  %1203 = vmatmul.msk.f32.gmra.mxu1 %vm528_vm4, %v77_v2 }
 0x19b   :  { %1222 = vmatmul.msk.f32.gmra.mxu2 %vm528_vm4, %v80_v15  ;;  %1237 = vmatmul.msk.f32.gmra.mxu3 %vm528_vm4, %v79_v5 }
 0x1a1   :  { %1188 = vmatmul.msk.f32.gmra.mxu0 %vm528_vm4, %v78_v4  ;;  %1204 = vmatmul.msk.f32.gmra.mxu1 %vm528_vm4, %v78_v4 }
 0x1a3   :  { %1223 = vmatmul.msk.f32.gmra.mxu2 %vm528_vm4, %v81_v62  ;;  %1238 = vmatmul.msk.f32.gmra.mxu3 %vm528_vm4, %v80_v15 }
 0x1a9   :  { %1189 = vmatmul.msk.f32.gmra.mxu0 %vm528_vm4, %v79_v5  ;;  %1205 = vmatmul.msk.f32.gmra.mxu1 %vm528_vm4, %v79_v5 }
 0x1ab   :  { %1224 = vmatmul.msk.f32.gmra.mxu2 %vm528_vm4, %v82_v41  ;;  %1239 = vmatmul.msk.f32.gmra.mxu3 %vm528_vm4, %v81_v62 }
 0x1b1   :  { %1190 = vmatmul.msk.f32.gmra.mxu0 %vm528_vm4, %v80_v15  ;;  %1206 = vmatmul.msk.f32.gmra.mxu1 %vm528_vm4, %v80_v15 }
 0x1b3   :  { %1225 = vmatmul.msk.f32.gmra.mxu2 %vm528_vm4, %v83_v21  ;;  %1240 = vmatmul.msk.f32.gmra.mxu3 %vm528_vm4, %v82_v41 }
 0x1b9   :  { %1191 = vmatmul.msk.f32.gmra.mxu0 %vm528_vm4, %v81_v62  ;;  %1207 = vmatmul.msk.f32.gmra.mxu1 %vm528_vm4, %v81_v62 }
 0x1bb   :  { %1226 = vmatmul.msk.f32.gmra.mxu2 %vm528_vm4, %v84_v20  ;;  %1241 = vmatmul.msk.f32.gmra.mxu3 %vm528_vm4, %v83_v21 }
 0x1c1   :  { %1192 = vmatmul.msk.f32.gmra.mxu0 %vm528_vm4, %v82_v41  ;;  %1208 = vmatmul.msk.f32.gmra.mxu1 %vm528_vm4, %v82_v41 }
 0x1c3   :  { %1227 = vmatmul.msk.f32.gmra.mxu2 %vm528_vm4, %v85_v0  ;;  %1242 = vmatmul.msk.f32.gmra.mxu3 %vm528_vm4, %v84_v20 }
 0x1c9   :  { %1193 = vmatmul.msk.f32.gmra.mxu0 %vm528_vm4, %v83_v21  ;;  %1209 = vmatmul.msk.f32.gmra.mxu1 %vm528_vm4, %v83_v21 }
 0x1cb   :  { %1228 = vmatmul.msk.f32.gmra.mxu2 %vm528_vm4, %v86_v50  ;;  %1243 = vmatmul.msk.f32.gmra.mxu3 %vm528_vm4, %v85_v0 }
 0x1d1   :  { %1194 = vmatmul.msk.f32.gmra.mxu0 %vm528_vm4, %v84_v20  ;;  %1210 = vmatmul.msk.f32.gmra.mxu1 %vm528_vm4, %v84_v20 }
 0x1d3   :  { %1229 = vmatmul.msk.f32.gmra.mxu2 %vm528_vm4, %v87_v44  ;;  %1244 = vmatmul.msk.f32.gmra.mxu3 %vm528_vm4, %v86_v50 }
 0x1d9   :  { %1195 = vmatmul.msk.f32.gmra.mxu0 %vm528_vm4, %v85_v0  ;;  %1211 = vmatmul.msk.f32.gmra.mxu1 %vm528_vm4, %v85_v0 }
 0x1db   :  { %1245 = vmatmul.msk.f32.gmra.mxu3 %vm528_vm4, %v87_v44 }
 0x1de   :  { %v1890_v36 = vpop.f32.mrf.mxu2 }
 0x1e1   :  { %1196 = vmatmul.msk.f32.gmra.mxu0 %vm528_vm4, %v86_v50  ;;  %1212 = vmatmul.msk.f32.gmra.mxu1 %vm528_vm4, %v86_v50 }
 0x1e6   :  { %v1894_v51 = vpop.f32.mrf.mxu2  ;;  %v1896_v17 = vpop.f32.mrf.mxu3 }
 0x1e9   :  { %1197 = vmatmul.msk.f32.gmra.mxu0 %vm528_vm4, %v87_v44  ;;  %1213 = vmatmul.msk.f32.gmra.mxu1 %vm528_vm4, %v87_v44 }
 0x1ee   :  { %v1900_v61 = vpop.f32.mrf.mxu0  ;;  %v1902_v28 = vpop.f32.mrf.mxu1 }
 0x1ef   :  { %2260 = vst [vmem:[#allocation22_spill] sm:$0xff] %v1900_v61  ;;  %v1904_v43 = vpop.f32.mrf.mxu2  ;;  %v1906_v7 = vpop.f32.mrf.mxu3 }
 0x1f0   :  { %2261 = vst [vmem:[#allocation23_spill] sm:$0xff] %v1902_v28 }
 0x1f6   :  { %v1908_v37 = vpop.f32.mrf.mxu0  ;;  %v1910_v49 = vpop.f32.mrf.mxu1 }
 0x1f7   :  { %2262 = vst [vmem:[#allocation24_spill] sm:$0xff] %v1908_v37  ;;  %v1912_v45 = vpop.f32.mrf.mxu2  ;;  %v1914_v47 = vpop.f32.mrf.mxu3 }
 0x1f8   :  { %2263 = vst [vmem:[#allocation25_spill] sm:$0xff] %v1910_v49 }
 0x1fe   :  { %v1916_v63 = vpop.f32.mrf.mxu0  ;;  %v1918_v12 = vpop.f32.mrf.mxu1 }
 0x1ff   :  { %2264 = vst [vmem:[#allocation26_spill] sm:$0xff] %v1916_v63  ;;  %v1920_v58 = vpop.f32.mrf.mxu2  ;;  %v1922_v38 = vpop.f32.mrf.mxu3 }
 0x200   :  { %2265 = vst [vmem:[#allocation27_spill] sm:$0xff] %v1918_v12 }
 0x206   :  { %v1924_v13 = vpop.f32.mrf.mxu0  ;;  %v1926_v24 = vpop.f32.mrf.mxu1 }
 0x207   :  { %2266 = vst [vmem:[#allocation28_spill] sm:$0xff] %v1924_v13  ;;  %v1928_v27 = vpop.f32.mrf.mxu2  ;;  %v1930_v25 = vpop.f32.mrf.mxu3 }
 0x208   :  { %2267 = vst [vmem:[#allocation29_spill] sm:$0xff] %v1926_v24 }
 0x20e   :  { %v1932_v46 = vpop.f32.mrf.mxu0  ;;  %v1934_v34 = vpop.f32.mrf.mxu1 }
 0x20f   :  { %v1936_v32 = vpop.f32.mrf.mxu2  ;;  %v1938_v48 = vpop.f32.mrf.mxu3 }
 0x216   :  { %v1940_v54 = vpop.f32.mrf.mxu0  ;;  %v1942_v3 = vpop.f32.mrf.mxu1 }
 0x217   :  { %v1944_v26 = vpop.f32.mrf.mxu2  ;;  %v1946_v57 = vpop.f32.mrf.mxu3 }
 0x21e   :  { %v1948_v18 = vpop.f32.mrf.mxu0  ;;  %v1950_v22 = vpop.f32.mrf.mxu1 }
 0x21f   :  { %v748_v14 = vpop.f32.mrf.mxu2  ;;  %v1952_v6 = vpop.f32.mrf.mxu3 }
 0x226   :  { %v1954_v31 = vpop.f32.mrf.mxu0  ;;  %v1956_v10 = vpop.f32.mrf.mxu1 }
 0x227   :  { %v751_v9 = vpop.f32.mrf.mxu2  ;;  %v1958_v23 = vpop.f32.mrf.mxu3 }
 0x228   :  { %v875_v24 = vmax.f32 %v751_v9, 0.0 }
 0x22e   :  { %v1960_v33 = vpop.f32.mrf.mxu0  ;;  %v1962_v11 = vpop.f32.mrf.mxu1 }
 0x22f   :  { %v754_v56 = vpop.f32.mrf.mxu2  ;;  %v1964_v42 = vpop.f32.mrf.mxu3 }
 0x230   :  { %v879_v63 = vmax.f32 %v754_v56, 0.0  ;;  %v864_v56 = vmax.f32 %v1946_v57, 0.0  ;;  %v839_v57 = vmax.f32 %v1890_v36, 0.0  ;;  %v88_v36 = vld [vmem:[%s2224_s4] sm:$0xff] }
 0x236   :  { %v1966_v35 = vpop.f32.mrf.mxu0  ;;  %v1968_v59 = vpop.f32.mrf.mxu1 }
 0x237   :  { %v757_v30 = vpop.f32.mrf.mxu2  ;;  %v1970_v40 = vpop.f32.mrf.mxu3 }
 0x238   :  { %v883_v49 = vmax.f32 %v757_v30, 0.0  ;;  %v867_v30 = vmax.f32 %v1944_v26, 0.0  ;;  %v872_v26 = vmax.f32 %v1958_v23, 0.0  ;;  %v847_v23 = vmax.f32 %v1904_v43, 0.0 }
 0x239   :  { %v870_v43 = vmax.f32 %v1962_v11, 0.0  ;;  %v862_v11 = vmax.f32 %v1950_v22, 0.0  ;;  %v853_v22 = vmax.f32 %v1932_v46, 0.0  ;;  %v2272_v46 = vld [vmem:[#allocation24_spill] sm:$0xff] }
 0x23e   :  { %v1972_v1 = vpop.f32.mrf.mxu0  ;;  %v1974_v2 = vpop.f32.mrf.mxu1 }
 0x23f   :  { %v760_v4 = vpop.f32.mrf.mxu2  ;;  %v822_v5 = vpop.f32.mrf.mxu3  ;;  %v877_v9 = vmax.f32 %v1972_v1, 0.0  ;;  %v869_v1 = vmax.f32 %v1960_v33, 0.0  ;;  %v861_v33 = vmax.f32 %v1948_v18, 0.0  ;;  %v844_v18 = vmax.f32 %v1906_v7, 0.0  ;;  %v2271_v7 = vld [vmem:[#allocation27_spill] sm:$0xff] }
 0x240   :  { %v887_v53 = vmax.f32 %v760_v4, 0.0 }
 0x246   :  { %v1976_v15 = vpop.f32.mrf.mxu0  ;;  %v1978_v62 = vpop.f32.mrf.mxu1 }
 0x247   :  { %v763_v41 = vpop.f32.mrf.mxu2  ;;  %v825_v21 = vpop.f32.mrf.mxu3 }
 0x248   :  { %v891_v16 = vmax.f32 %v763_v41, 0.0  ;;  %v888_v41 = vmax.f32 %v825_v21, 0.0  ;;  %v846_v21 = vmax.f32 %v2271_v7, 0.0 }
 0x24e   :  { %v1980_v20 = vpop.f32.mrf.mxu0  ;;  %v1982_v0 = vpop.f32.mrf.mxu1 }
 0x24f   :  { %v766_v50 = vpop.f32.mrf.mxu2  ;;  %v828_v44 = vpop.f32.mrf.mxu3 }
 0x250   :  { %v895_v52 = vmax.f32 %v766_v50, 0.0  ;;  %v892_v13 = vmax.f32 %v828_v44, 0.0  ;;  %v2275_v44 = vld [vmem:[#allocation23_spill] sm:$0xff] }
 0x256   :  { %v633_v39 = vpop.f32.mrf.mxu0  ;;  %v698_v8 = vpop.f32.mrf.mxu1 }
 0x257   :  { %v769_v29 = vpop.f32.mrf.mxu2  ;;  %v831_v19 = vpop.f32.mrf.mxu3 }
 0x258   :  { %v899_v60 = vmax.f32 %v769_v29, 0.0  ;;  %v896_v37 = vmax.f32 %v831_v19, 0.0  ;;  %v871_v29 = vmax.f32 %v748_v14, 0.0  ;;  %v884_v19 = vmax.f32 %v822_v5, 0.0 }
 0x259   :  { %v868_v14 = vmax.f32 %v1952_v6, 0.0  ;;  %v843_v6 = vmax.f32 %v1894_v51, 0.0  ;;  %v866_v51 = vmax.f32 %v1956_v10, 0.0  ;;  %v854_v10 = vmax.f32 %v1934_v34, 0.0 }
 0x25a   :  { %947 = vmatpush.msrb.mxu2 %v899_v60  ;;  %v841_v34 = vmax.f32 %v2272_v46, 0.0 }
 0x25c   :  { %948 = vmatpush.msrb.mxu2 %v895_v52 }
 0x25e   :  { %949 = vmatpush.msrb.mxu2 %v891_v16  ;;  %v636_v55 = vpop.f32.mrf.mxu0  ;;  %v701_v28 = vpop.f32.mrf.mxu1 }
 0x25f   :  { %v834_v61 = vpop.f32.mrf.mxu3 }
 0x260   :  { %v900_v12 = vmax.f32 %v834_v61, 0.0  ;;  %950 = vmatpush.msrb.mxu2 %v887_v53  ;;  %v893_v53 = vmax.f32 %v636_v55, 0.0  ;;  %v894_v61 = vmax.f32 %v701_v28, 0.0  ;;  %v885_v55 = vmax.f32 %v1980_v20, 0.0  ;;  %v2273_v20 = vld [vmem:[#allocation25_spill] sm:$0xff] }
 0x261   :  { %v886_v28 = vmax.f32 %v1982_v0, 0.0  ;;  %v842_v0 = vmax.f32 %v2273_v20, 0.0  ;;  %v1265_v20 = vld [vmem:[#allocation2 + $0x18] sm:$0xff] }
 0x262   :  { %951 = vmatpush.msrb.mxu2 %v883_v49  ;;  %970 = vmatpush.msrb.mxu3 %v900_v12  ;;  %v863_v49 = vmax.f32 %v1936_v32, 0.0  ;;  %v890_v12 = vmax.f32 %v698_v8, 0.0  ;;  %v855_v32 = vmax.f32 %v1920_v58, 0.0  ;;  %v882_v8 = vmax.f32 %v1978_v62, 0.0 }
 0x263   :  { %v878_v58 = vmax.f32 %v1974_v2, 0.0  ;;  %v840_v2 = vmax.f32 %v1896_v17, 0.0  ;;  %v2274_v17 = vld [vmem:[#allocation22_spill] sm:$0xff] }
 0x264   :  { %952 = vmatpush.msrb.mxu2 %v879_v63  ;;  %971 = vmatpush.msrb.mxu3 %v896_v37  ;;  %v880_v37 = vmax.f32 %v1970_v40, 0.0  ;;  %v889_v63 = vmax.f32 %v633_v39, 0.0  ;;  %v881_v39 = vmax.f32 %v1976_v15, 0.0  ;;  %v860_v40 = vmax.f32 %v1938_v48, 0.0  ;;  %v2269_v15 = vld [vmem:[#allocation29_spill] sm:$0xff] }
 0x265   :  { %v852_v48 = vmax.f32 %v1922_v38, 0.0  ;;  %v858_v38 = vmax.f32 %v1942_v3, 0.0  ;;  %v2270_v3 = vld [vmem:[#allocation26_spill] sm:$0xff]  ;;  %v837_v50 = vmax.f32 %v2274_v17, 0.0  ;;  %v1266_v17 = vld [vmem:[#allocation2 + $0x58] sm:$0xff] }
 0x266   :  { %953 = vmatpush.msrb.mxu2 %v875_v24  ;;  %972 = vmatpush.msrb.mxu3 %v892_v13  ;;  %v639_v60 = vpop.f32.mrf.mxu0  ;;  %v704_v16 = vpop.f32.mrf.mxu1  ;;  %v859_v13 = vmax.f32 %v1928_v27, 0.0  ;;  %v876_v24 = vmax.f32 %v1964_v42, 0.0  ;;  %v851_v27 = vmax.f32 %v1912_v45, 0.0  ;;  %v873_v42 = vmax.f32 %v1966_v35, 0.0 }
 0x267   :  { %v897_v52 = vmax.f32 %v639_v60, 0.0  ;;  %v898_v4 = vmax.f32 %v704_v16, 0.0  ;;  %v874_v45 = vmax.f32 %v1968_v59, 0.0  ;;  %v856_v35 = vmax.f32 %v1930_v25, 0.0 }
 0x268   :  { %954 = vmatpush.msrb.mxu2 %v871_v29  ;;  %973 = vmatpush.msrb.mxu3 %v888_v41  ;;  %v865_v59 = vmax.f32 %v1954_v31, 0.0  ;;  %v848_v25 = vmax.f32 %v1914_v47, 0.0  ;;  %v857_v31 = vmax.f32 %v1940_v54, 0.0  ;;  %v2268_v47 = vld [vmem:[#allocation28_spill] sm:$0xff]  ;;  %v850_v54 = vmax.f32 %v2269_v15, 0.0 }
 0x269   :  { %901 = vmatpush.msrb.mxu0 %v897_v52  ;;  %924 = vmatpush.msrb.mxu1 %v898_v4  ;;  %v849_v5 = vmax.f32 %v2268_v47, 0.0  ;;  %v845_v62 = vmax.f32 %v2270_v3, 0.0  ;;  %v838_v29 = vmax.f32 %v2275_v44, 0.0  ;;  %v2035_v41 = vld [vmem:[%s2225_s5] sm:$0xf] }
 0x26a   :  { %955 = vmatpush.msrb.mxu2 %v867_v30  ;;  %974 = vmatpush.msrb.mxu3 %v884_v19  ;;  %v995_v60 = vperm.slane %v2035_v41, 0  ;;  %v996_v16 = vperm.slane %v2035_v41, 1 }
 0x26b   :  { %902 = vmatpush.msrb.mxu0 %v893_v53  ;;  %925 = vmatpush.msrb.mxu1 %v894_v61  ;;  %v997_v53 = vperm.slane %v2035_v41, 2  ;;  %v998_v61 = vperm.slane %v2035_v41, 3 }
 0x26c   :  { %956 = vmatpush.msrb.mxu2 %v863_v49  ;;  %975 = vmatpush.msrb.mxu3 %v880_v37 }
 0x26d   :  { %903 = vmatpush.msrb.mxu0 %v889_v63  ;;  %926 = vmatpush.msrb.mxu1 %v890_v12  ;;  %v1259_v63 = vld [vmem:[%s2220_s0] sm:$0xff] }
 0x26e   :  { %957 = vmatpush.msrb.mxu2 %v859_v13  ;;  %976 = vmatpush.msrb.mxu3 %v876_v24  ;;  %v1260_v13 = vld [vmem:[%s2220_s0 + $0x8] sm:$0xff] }
 0x26f   :  { %904 = vmatpush.msrb.mxu0 %v885_v55  ;;  %927 = vmatpush.msrb.mxu1 %v886_v28 }
 0x270   :  { %958 = vmatpush.msrb.mxu2 %v855_v32  ;;  %977 = vmatpush.msrb.mxu3 %v872_v26  ;;  %v1261_v32 = vld [vmem:[%s2220_s0 + $0x10] sm:$0xff] }
 0x271   :  { %905 = vmatpush.msrb.mxu0 %v881_v39  ;;  %928 = vmatpush.msrb.mxu1 %v882_v8  ;;  %v1262_v39 = vld [vmem:[%s2220_s0 + $0x18] sm:$0xff] }
 0x272   :  { %959 = vmatpush.msrb.mxu2 %v851_v27  ;;  %978 = vmatpush.msrb.mxu3 %v868_v14  ;;  %v2276_v27 = vld [vmem:[#allocation11_spill] sm:$0xff]  ;;  %v2277_v14 = vld [vmem:[#allocation9_spill] sm:$0xff] }
 0x273   :  { %906 = vmatpush.msrb.mxu0 %v877_v9  ;;  %929 = vmatpush.msrb.mxu1 %v878_v58  ;;  %v2278_v9 = vmax.f32 %v2276_v27, %v2277_v14 }
 0x274   :  { %960 = vmatpush.msrb.mxu2 %v847_v23  ;;  %979 = vmatpush.msrb.mxu3 %v864_v56  ;;  %v2279_v23 = vld [vmem:[#allocation13_spill] sm:$0xff]  ;;  %v2280_v56 = vld [vmem:[#allocation14_spill] sm:$0xff] }
 0x275   :  { %907 = vmatpush.msrb.mxu0 %v873_v42  ;;  %930 = vmatpush.msrb.mxu1 %v874_v45  ;;  %v2084_v58 = vmax.f32 %v1259_v63, %v2278_v9  ;;  %v2281_v42 = vmax.f32 %v2279_v23, %v2280_v56 }
 0x276   :  { %961 = vmatpush.msrb.mxu2 %v843_v6  ;;  %980 = vmatpush.msrb.mxu3 %v860_v40  ;;  %v2282_v6 = vld [vmem:[#allocation12_spill] sm:$0xff]  ;;  %v2283_v40 = vld [vmem:[#allocation15_spill] sm:$0xff] }
 0x277   :  { %908 = vmatpush.msrb.mxu0 %v869_v1  ;;  %931 = vmatpush.msrb.mxu1 %v870_v43  ;;  %v2095_v45 = vmax.f32 %v1261_v32, %v2281_v42  ;;  %v2284_v1 = vmax.f32 %v2282_v6, %v2283_v40 }
 0x278   :  { %962 = vmatpush.msrb.mxu2 %v839_v57  ;;  %981 = vmatpush.msrb.mxu3 %v856_v35  ;;  %v2285_v57 = vld [vmem:[#allocation8_spill] sm:$0xff]  ;;  %v2286_v35 = vld [vmem:[#allocation10_spill] sm:$0xff] }
 0x279   :  { %909 = vmatpush.msrb.mxu0 %v865_v59  ;;  %932 = vmatpush.msrb.mxu1 %v866_v51  ;;  %v2100_v43 = vmax.f32 %v1262_v39, %v2284_v1  ;;  %v2287_v59 = vmax.f32 %v2285_v57, %v2286_v35 }
 0x27a   :  { %982 = vmatpush.msrb.mxu3 %v852_v48  ;;  %963 = vmatmul.f32.vlgmr.msrb.gmra.mxu2 %v88_v36  ;;  %v89_v48 = vld [vmem:[%s2224_s4 + $0x8] sm:$0xff] }
 0x27b   :  { %910 = vmatpush.msrb.mxu0 %v861_v33  ;;  %933 = vmatpush.msrb.mxu1 %v862_v11  ;;  %v2105_v51 = vmax.f32 %v1260_v13, %v2287_v59 }
 0x27c   :  { %983 = vmatpush.msrb.mxu3 %v848_v25 }
 0x27d   :  { %911 = vmatpush.msrb.mxu0 %v857_v31  ;;  %934 = vmatpush.msrb.mxu1 %v858_v38 }
 0x27e   :  { %984 = vmatpush.msrb.mxu3 %v844_v18 }
 0x27f   :  { %912 = vmatpush.msrb.mxu0 %v853_v22  ;;  %935 = vmatpush.msrb.mxu1 %v854_v10  ;;  %v1263_v22 = vld [vmem:[#allocation2] sm:$0xff] }
 0x280   :  { %985 = vmatpush.msrb.mxu3 %v840_v2  ;;  %v1264_v2 = vld [vmem:[#allocation2 + $0x40] sm:$0xff] }
 0x281   :  { %913 = vmatpush.msrb.mxu0 %v849_v5  ;;  %936 = vmatpush.msrb.mxu1 %v850_v54 }
 0x282   :  { %986 = vmatmul.f32.vlgmr.msrb.gmra.mxu3 %v88_v36  ;;  %966 = vmatmul.f32.gmra.mxu2 %v89_v48 }
 0x283   :  { %914 = vmatpush.msrb.mxu0 %v845_v62  ;;  %937 = vmatpush.msrb.mxu1 %v846_v21 }
 0x285   :  { %915 = vmatpush.msrb.mxu0 %v841_v34  ;;  %938 = vmatpush.msrb.mxu1 %v842_v0 }
 0x287   :  { %916 = vmatpush.msrb.mxu0 %v837_v50  ;;  %939 = vmatpush.msrb.mxu1 %v838_v29 }
 0x288   :  { %917 = vmatmul.f32.vlgmr.msrb.gmra.mxu0 %v88_v36  ;;  %940 = vmatmul.f32.vlgmr.msrb.gmra.mxu1 %v88_v36 }
 0x28a   :  { %989 = vmatmul.f32.gmra.mxu3 %v89_v48 }
 0x290   :  { %920 = vmatmul.f32.gmra.mxu0 %v89_v48  ;;  %943 = vmatmul.f32.gmra.mxu1 %v89_v48 }
 0x2fd   :  { %v964_v49 = vpop.f32.mrf.mxu2 }
 0x2fe   :  { %v1005_v55 = vmul.f32 %v997_v53, %v964_v49  ;;  %v1269_v49 = vld [vmem:[#allocation2 + $0x48] sm:$0xff] }
 0x300   :  { %v2068_v26 = vadd.f32 %v1261_v32, %v1005_v55 }
 0x305   :  { %v918_v52 = vpop.f32.mrf.mxu0  ;;  %v941_v4 = vpop.f32.mrf.mxu1 }
 0x306   :  { %v1003_v30 = vmul.f32 %v995_v60, %v918_v52  ;;  %v1004_v19 = vmul.f32 %v996_v16, %v941_v4  ;;  %v987_v37 = vpop.f32.mrf.mxu3  ;;  %v1267_v52 = vld [vmem:[#allocation2 + $0x8] sm:$0xff] }
 0x307   :  { %v1006_v28 = vmul.f32 %v998_v61, %v987_v37 }
 0x308   :  { %v2048_v12 = vadd.f32 %v1259_v63, %v1003_v30  ;;  %v2053_v24 = vadd.f32 %v1260_v13, %v1004_v19  ;;  %v1268_v30 = vld [vmem:[#allocation2 + $0x10] sm:$0xff] }
 0x309   :  { %v2073_v8 = vadd.f32 %v1262_v39, %v1006_v28  ;;  %v1270_v63 = vld [vmem:[#allocation2 + $0x50] sm:$0xff] }
 0x30a   :  { %1025 = vrot.lane.b32.xlu1 %v2053_v24, %s1333_s1  ;;  %1047 = vrot.lane.b32.xlu2 %v2048_v12, %s1334_s20 }
 0x30b   :  { %1023 = vrot.lane.b32.xlu0 %v2048_v12, %s1333_s1 }
 0x312   :  { %1044 = vrot.lane.b32.xlu1 %v2073_v8, %s1334_s20  ;;  %1027 = vrot.lane.b32.xlu2 %v2068_v26, %s1333_s1 }
 0x313   :  { %1029 = vrot.lane.b32.xlu0 %v2073_v8, %s1333_s1 }
 0x31a   :  { %1051 = vrot.lane.b32.xlu1 %v2068_v26, %s1334_s20  ;;  %162 = vrot.lane.b32.xlu2 %v2084_v58, %s1336_s22 }
 0x31b   :  { %1049 = vrot.lane.b32.xlu0 %v2053_v24, %s1334_s20 }
 0x322   :  { %166 = vrot.lane.b32.xlu1 %v2095_v45, %s1336_s22  ;;  %168 = vrot.lane.b32.xlu2 %v2100_v43, %s1336_s22 }
 0x323   :  { %164 = vrot.lane.b32.xlu0 %v2105_v51, %s1336_s22 }
 0x32a   :  { %187 = vrot.lane.b32.xlu1 %v2084_v58, %s1335_s21  ;;  %189 = vrot.lane.b32.xlu2 %v2105_v51, %s1335_s21 }
 0x32b   :  { %184 = vrot.lane.b32.xlu0 %v2100_v43, %s1335_s21 }
 0x333   :  { %191 = vrot.lane.b32.xlu0 %v2095_v45, %s1335_s21 }
 0x364   :  { %v1048_v36 = vpop.permute.xlu2 %1047 }
 0x36c   :  { %v1028_v54 = vpop.permute.xlu2 %1027 }
 0x374   :  { %v163_v9 = vpop.permute.xlu2 %162 }
 0x37c   :  { %v1026_v33 = vpop.permute.xlu1 %1025  ;;  %v169_v23 = vpop.permute.xlu2 %168 }
 0x37d   :  { %v1024_v11 = vpop.permute.xlu0 %1023  ;;  %v1032_v62 = vsel %vm114_vm1, %v1026_v33, %v1028_v54 }
 0x37e   :  { %v1031_v25 = vsel %vm114_vm1, %v1024_v11, %v1026_v33  ;;  %v1041_v4 = vmul.f32 %v1267_v52, %v1032_v62 }
 0x37f   :  { %v1040_v10 = vmul.f32 %v1263_v22, %v1031_v25 }
 0x384   :  { %v1045_v31 = vpop.permute.xlu1 %1044  ;;  %v190_v56 = vpop.permute.xlu2 %189 }
 0x385   :  { %v1060_v38 = vsel %vm137_vm0, %v1045_v31, %v1048_v36  ;;  %v1030_v18 = vpop.permute.xlu0 %1029 }
 0x386   :  { %v1061_v47 = vmul.f32 %v1264_v2, %v1060_v38  ;;  %v1039_v3 = vsel %vm114_vm1, %v1030_v18, %v1024_v11  ;;  %v1033_v7 = vsel %vm114_vm1, %v1028_v54, %v1030_v18  ;;  %v179_v11 = vsel %vm170_vm2, %v169_v23, %v163_v9  ;;  %v2289_v38 = vld [vmem:[#allocation17_spill] sm:$0xff] }
 0x387   :  { %v1043_v0 = vmul.f32 %v1265_v20, %v1039_v3  ;;  %v1042_v19 = vmul.f32 %v1268_v30, %v1033_v7  ;;  %v183_v18 = vmul.f32 %v179_v11, %v2289_v38 }
 0x388   :  { %v1065_v5 = vmax.f32 %v1040_v10, %v1061_v47 }
 0x38a   :  { %v2127_v15 = vmax.f32 %v2048_v12, %v1065_v5 }
 0x38c   :  { %v1052_v21 = vpop.permute.xlu1 %1051  ;;  %1077 = vrot.lane.b32.xlu1 %v2127_v15, %s1336_s22 }
 0x38d   :  { %v1055_v46 = vsel %vm137_vm0, %v1052_v21, %v1045_v31  ;;  %v1050_v34 = vpop.permute.xlu0 %1049 }
 0x38e   :  { %v1064_v50 = vmul.f32 %v1266_v17, %v1055_v46  ;;  %v1053_v44 = vsel %vm137_vm0, %v1048_v36, %v1050_v34  ;;  %v1054_v29 = vsel %vm137_vm0, %v1050_v34, %v1052_v21  ;;  %v2288_v36 = vld [vmem:[#allocation16_spill] sm:$0xff]  ;;  %v1271_v46 = vld [vmem:[#allocation2 + $0xd8] sm:$0xff] }
 0x38f   :  { %v1062_v37 = vmul.f32 %v1269_v49, %v1053_v44  ;;  %v1063_v13 = vmul.f32 %v1270_v63, %v1054_v29  ;;  %v2291_v29 = vld [vmem:[#allocation21_spill] sm:$0xff] }
 0x390   :  { %v1068_v55 = vmax.f32 %v1043_v0, %v1064_v50  ;;  %v990_v0 = vpop.f32.mrf.mxu3  ;;  %v2290_v50 = vld [vmem:[#allocation20_spill] sm:$0xff] }
 0x391   :  { %v1066_v28 = vmax.f32 %v1041_v4, %v1062_v37  ;;  %v1067_v32 = vmax.f32 %v1042_v19, %v1063_v13  ;;  %v1272_v4 = vld [vmem:[#allocation2 + $0xd0] sm:$0xff]  ;;  %v2292_v37 = vld [vmem:[#allocation19_spill] sm:$0xff] }
 0x392   :  { %v1072_v39 = vmax.f32 %v2073_v8, %v1068_v55  ;;  %v2293_v13 = vld [vmem:[#allocation18_spill] sm:$0xff] }
 0x393   :  { %v2139_v27 = vmax.f32 %v2068_v26, %v1067_v32  ;;  %v2142_v14 = vmax.f32 %v2053_v24, %v1066_v28  ;;  %v1010_v28 = vmul.f32 %v998_v61, %v990_v0  ;;  %v1273_v32 = vld [vmem:[#allocation2 + $0x90] sm:$0xff]  ;;  %v1274_v61 = vld [vmem:[%s2220_s0 + $0x38] sm:$0xff] }
 0x394   :  { %1083 = vrot.lane.b32.xlu1 %v1072_v39, %s1336_s22  ;;  %v167_v6 = vpop.permute.xlu1 %166 }
 0x395   :  { %1081 = vrot.lane.b32.xlu0 %v2139_v27, %s1336_s22  ;;  %1079 = vrot.lane.b32.xlu2 %v2142_v14, %s1336_s22  ;;  %v165_v42 = vpop.permute.xlu0 %164  ;;  %v173_v17 = vsel %vm170_vm2, %v167_v6, %v169_v23 }
 0x396   :  { %v171_v7 = vsel %vm170_vm2, %v163_v9, %v165_v42  ;;  %v172_v21 = vsel %vm170_vm2, %v165_v42, %v167_v6  ;;  %v182_v9 = vmul.f32 %v1273_v32, %v173_v17 }
 0x397   :  { %v180_v63 = vmul.f32 %v171_v7, %v2292_v37  ;;  %v181_v55 = vmul.f32 %v172_v21, %v2293_v13  ;;  %v944_v7 = vpop.f32.mrf.mxu1 }
 0x39c   :  { %1103 = vrot.lane.b32.xlu1 %v2142_v14, %s1335_s21  ;;  %v188_v57 = vpop.permute.xlu1 %187 }
 0x39d   :  { %1101 = vrot.lane.b32.xlu0 %v2127_v15, %s1335_s21  ;;  %1098 = vrot.lane.b32.xlu2 %v1072_v39, %s1335_s21  ;;  %v185_v1 = vpop.permute.xlu0 %184  ;;  %v194_v10 = vsel %vm193_vm3, %v188_v57, %v190_v56 }
 0x39e   :  { %v201_v2 = vsel %vm193_vm3, %v185_v1, %v188_v57  ;;  %v203_v52 = vmul.f32 %v194_v10, %v2291_v29 }
 0x39f   :  { %v202_v44 = vmul.f32 %v201_v2, %v2290_v50 }
 0x3a1   :  { %v206_v6 = vmax.f32 %v180_v63, %v202_v44  ;;  %v1008_v44 = vmul.f32 %v996_v16, %v944_v7  ;;  %v1276_v16 = vld [vmem:[%s2220_s0 + $0x28] sm:$0xff] }
 0x3a5   :  { %1105 = vrot.lane.b32.xlu2 %v2139_v27, %s1335_s21  ;;  %v192_v59 = vpop.permute.xlu0 %191 }
 0x3a6   :  { %v196_v33 = vsel %vm193_vm3, %v192_v59, %v185_v1  ;;  %v195_v54 = vsel %vm193_vm3, %v190_v56, %v192_v59  ;;  %v207_v1 = vmax.f32 %v181_v55, %v203_v52  ;;  %v1277_v52 = vld [vmem:[%s2220_s0 + $0x30] sm:$0xff] }
 0x3a7   :  { %v205_v25 = vmul.f32 %v196_v33, %v2288_v36  ;;  %v204_v30 = vmul.f32 %v1272_v4, %v195_v54  ;;  %v1018_v36 = vadd.f32 %v1274_v61, %v1010_v28  ;;  %v921_v54 = vpop.f32.mrf.mxu0 }
 0x3a8   :  { %v211_v0 = vmax.f32 %v2105_v51, %v207_v1 }
 0x3a9   :  { %v209_v47 = vmax.f32 %v183_v18, %v205_v25  ;;  %v208_v57 = vmax.f32 %v182_v9, %v204_v30  ;;  %v1337_v25 = vmov 0.0  }
 0x3aa   :  { %vm215_vm14 = vcmp.gt.f32.partialorder %v211_v0, 0.1 }
 0x3ab   :  { %v213_v19 = vmax.f32 %v2100_v43, %v209_v47 }
 0x3ad   :  { %vm217_vm5 = vcmp.gt.f32.partialorder %v213_v19, 0.1 }
 0x3ef   :  { %v1080_v40 = vpop.permute.xlu2 %1079 }
 0x3f7   :  { %v1099_v35 = vpop.permute.xlu2 %1098 }
 0x3fe   :  { %v1078_v48 = vpop.permute.xlu1 %1077 }
 0x3ff   :  { %v1106_v31 = vpop.permute.xlu2 %1105  ;;  %v1085_v23 = vsel %vm170_vm2, %v1078_v48, %v1080_v40 }
 0x400   :  { %v1109_v22 = vsel %vm193_vm3, %v1106_v31, %v1099_v35  ;;  %v1094_v33 = vmul.f32 %v1085_v23, %v2292_v37 }
 0x401   :  { %v1118_v34 = vmul.f32 %v1271_v46, %v1109_v22 }
 0x406   :  { %v1084_v5 = vpop.permute.xlu1 %1083 }
 0x407   :  { %v1082_v3 = vpop.permute.xlu0 %1081  ;;  %v1093_v62 = vsel %vm170_vm2, %v1084_v5, %v1078_v48 }
 0x408   :  { %v1097_v20 = vmul.f32 %v1093_v62, %v2289_v38  ;;  %v1087_v56 = vsel %vm170_vm2, %v1082_v3, %v1084_v5  ;;  %v1086_v43 = vsel %vm170_vm2, %v1080_v40, %v1082_v3  ;;  %v210_v3 = vmax.f32 %v2084_v58, %v206_v6 }
 0x409   :  { %v1096_v11 = vmul.f32 %v1273_v32, %v1087_v56  ;;  %v1095_v10 = vmul.f32 %v1086_v43, %v2293_v13  ;;  %v212_v62 = vmax.f32 %v2095_v45, %v208_v57 }
 0x40a   :  { %v1122_v49 = vmax.f32 %v1097_v20, %v1118_v34  ;;  %v967_v20 = vpop.f32.mrf.mxu2  ;;  %vm214_vm10 = vcmp.gt.f32.partialorder %v210_v3, 0.1 }
 0x40b   :  { %vm216_vm8 = vcmp.gt.f32.partialorder %v212_v62, 0.1 }
 0x40c   :  { %v1126_v42 = vmax.f32 %v1072_v39, %v1122_v49 }
 0x40e   :  { %vm1130_vm6 = vcmp.gt.f32.partialorder %v1126_v42, 0.1  ;;  %v1104_v59 = vpop.permute.xlu1 %1103 }
 0x40f   :  { %vm1134_vm7 = vmand %vm217_vm5, %vm1130_vm6  ;;  %v1102_v48 = vpop.permute.xlu0 %1101  ;;  %v1108_v39 = vsel %vm193_vm3, %v1104_v59, %v1106_v31 }
 0x410   :  { %v1249_v38 = vsel %vm1134_vm7, 1.0, %v1337_v25  ;;  %v1114_v18 = vsel %vm193_vm3, %v1099_v35, %v1102_v48  ;;  %v1107_v40 = vsel %vm193_vm3, %v1102_v48, %v1104_v59  ;;  %v1117_v22 = vmul.f32 %v1272_v4, %v1108_v39 }
 0x411   :  { %v1146_v2 = vperm.slane %v1249_v38, 3  ;;  %v1115_v47 = vmul.f32 %v1114_v18, %v2290_v50  ;;  %v1116_v5 = vmul.f32 %v1107_v40, %v2291_v29  ;;  %v1007_v50 = vmul.f32 %v995_v60, %v921_v54  ;;  %v1275_v60 = vld [vmem:[%s2220_s0 + $0x20] sm:$0xff] }
 0x412   :  { %v1121_v31 = vmax.f32 %v1096_v11, %v1117_v22 }
 0x413   :  { %v1150_v21 = vmul.f32 %v1146_v2, %v2073_v8  ;;  %v1154_v35 = vmul.f32 %v1146_v2, %v1018_v36  ;;  %v1119_v46 = vmax.f32 %v1094_v33, %v1115_v47  ;;  %v1120_v34 = vmax.f32 %v1095_v10, %v1116_v5 }
 0x414   :  { %v1125_v17 = vmax.f32 %v2139_v27, %v1121_v31  ;;  %v1009_v8 = vmul.f32 %v997_v53, %v967_v20  ;;  %v1015_v51 = vadd.f32 %v1275_v60, %v1007_v50 }
 0x415   :  { %1158 = vst [vmem:[#allocation5 + $0x18] sm:$0xff] %v1150_v21  ;;  %v1123_v58 = vmax.f32 %v2127_v15, %v1119_v46  ;;  %v1124_v45 = vmax.f32 %v2142_v14, %v1120_v34  ;;  %v1016_v14 = vadd.f32 %v1276_v16, %v1008_v44 }
 0x416   :  { %1162 = vst [vmem:[#allocation5 + $0x38] sm:$0xff] %v1154_v35  ;;  %vm1129_vm9 = vcmp.gt.f32.partialorder %v1125_v17, 0.1  ;;  %v1017_v4 = vadd.f32 %v1277_v52, %v1009_v8 }
 0x417   :  { %vm1127_vm11 = vcmp.gt.f32.partialorder %v1123_v58, 0.1  ;;  %vm1128_vm12 = vcmp.gt.f32.partialorder %v1124_v45, 0.1  ;;  %vm1133_vm13 = vmand %vm216_vm8, %vm1129_vm9 }
 0x418   :  { %vm1131_vm15 = vmand %vm214_vm10, %vm1127_vm11  ;;  %v1248_v15 = vsel %vm1133_vm13, 1.0, %v1337_v25 }
 0x419   :  { %v1246_v27 = vsel %vm1131_vm15, 1.0, %v1337_v25  ;;  %vm1132_vm0 = vmand %vm215_vm14, %vm1128_vm12  ;;  %v1145_v41 = vperm.slane %v1248_v15, 3 }
 0x41a   :  { %v1143_v53 = vperm.slane %v1246_v27, 3  ;;  %v1247_v29 = vsel %vm1132_vm0, 1.0, %v1337_v25 }
 0x41b   :  { %v1144_v30 = vperm.slane %v1247_v29, 3  ;;  %v1149_v19 = vmul.f32 %v1145_v41, %v2068_v26  ;;  %v1153_v55 = vmul.f32 %v1145_v41, %v1017_v4 }
 0x41c   :  { %v1147_v49 = vmul.f32 %v1143_v53, %v2048_v12  ;;  %v1151_v37 = vmul.f32 %v1143_v53, %v1015_v51 }
 0x41d   :  { %v1148_v63 = vmul.f32 %v1144_v30, %v2053_v24  ;;  %v1152_v13 = vmul.f32 %v1144_v30, %v1016_v14  ;;  %1157 = vst [vmem:[#allocation5 + $0x10] sm:$0xff] %v1149_v19 }
 0x41e   :  { %1155 = vst [vmem:[#allocation5] sm:$0xff] %v1147_v49 }
 0x41f   :  { %1159 = vst [vmem:[#allocation5 + $0x20] sm:$0xff] %v1151_v37 }
 0x420   :  { %1156 = vst [vmem:[#allocation5 + $0x8] sm:$0xff] %v1148_v63 }
 0x421   :  { %1160 = vst [vmem:[#allocation5 + $0x28] sm:$0xff] %v1152_v13 }
 0x422   :  { %1161 = vst [vmem:[#allocation5 + $0x30] sm:$0xff] %v1153_v55 }
 0x423   :  { %1175 = dma.vmem_to_hbm [thread:$0]  %s1168_s16, 1024, %s1170_s19, [#allocation4], %s1331_s26, %s1331_s26, %s1332_s27  }
 0x424   :  { %1328 = dma.done.wait [#allocation4], 1024  }
 0x425   :  { %1329 = vsyncadd [#allocation4], 4294966272 }
 0x426   :  { %1180 = vsyncpa [#allocation3], 1 }
 0x427   :  { %1181 = vsyncpa [#allocation4], 1 }

</bundles_post_ra>
